<compile_context>
chip_gen: v5e
topology: v5e:2x2
jax: 0.10.0
libtpu: 0.0.40
codegen_flags: <defaults>
</compile_context>

<pallas_src>
import functools

import jax
import jax.numpy as jnp
from jax import lax
from jax.experimental import pallas as pl
from jax.experimental.pallas import tpu as pltpu


# ---------------------------------------------------------------------------
# Fused kernel: conv1+bn1+relu -> conv2(3x3)+bn2+relu -> conv3+bn3 +
#               residual conv+bn -> add -> relu, on one (TH x W) row tile.
# ---------------------------------------------------------------------------
def _convblock_kernel(x_top_ref, x_ref, x_bot_ref,
                      w1_ref, b1_ref,
                      w2_ref, b2_ref,
                      w3_ref, wr_ref, b3_ref,
                      out_ref, x2_ref,
                      h1pad_ref,
                      *, TH, W, Cin, c, Cout, cdt):
    r = pl.program_id(1)
    n_r = pl.num_programs(1)
    f32 = jnp.float32

    w1 = w1_ref[...]           # (Cin, c), BN scale folded in
    b1 = b1_ref[...]           # (1, c)

    def conv1(x2d):            # (M, Cin) -> (M, c) f32, conv1x1 + BN + ReLU
        y = jnp.dot(x2d, w1, preferred_element_type=f32)
        return jnp.maximum(y + b1, 0.0)

    # ---- stage 1: 1x1 conv + BN + ReLU, written straight into the zero-
    #      padded VMEM scratch (main TH rows + 1-row top/bottom halos). ------
    zero_col = jnp.zeros((TH + 2, 1, c), dtype=cdt)
    h1pad_ref[:, 0:1, :] = zero_col                       # left  zero column
    h1pad_ref[:, W + 1:W + 2, :] = zero_col               # right zero column

    xm = x_ref[0].reshape(TH * W, Cin)                    # reused by residual
    h_main = conv1(xm)
    h1pad_ref[1:TH + 1, 1:W + 1, :] = h_main.reshape(TH, W, c).astype(cdt)

    # Halo rows outside the image must be zero (SAME padding of the 3x3 conv
    # applies to h1). The halo BlockSpec indices are clamped, so mask here.
    top_ok = jnp.where(r > 0, 1.0, 0.0).astype(f32)
    bot_ok = jnp.where(r < n_r - 1, 1.0, 0.0).astype(f32)
    h_top = conv1(x_top_ref[0].reshape(W, Cin)) * top_ok
    h_bot = conv1(x_bot_ref[0].reshape(W, Cin)) * bot_ok
    h1pad_ref[0:1, 1:W + 1, :] = h_top.reshape(1, W, c).astype(cdt)
    h1pad_ref[TH + 1:TH + 2, 1:W + 1, :] = h_bot.reshape(1, W, c).astype(cdt)

    # ---- stage 2: 3x3 conv + BN + ReLU as 9 accumulating K=c matmuls -------
    acc2 = jnp.zeros((TH * W, c), dtype=f32)
    for k in range(9):
        kh, kw = k // 3, k % 3
        tap = h1pad_ref[kh:kh + TH, kw:kw + W, :].reshape(TH * W, c)
        acc2 = acc2 + jnp.dot(tap, w2_ref[k * c:(k + 1) * c, :],
                              preferred_element_type=f32)
    y2 = jnp.maximum(acc2 + b2_ref[...], 0.0)             # (TH*W, c) f32
    x2_ref[0] = y2.reshape(TH, W, c).astype(x2_ref.dtype)

    # ---- stage 3: 1x1 conv + residual 1x1 conv (BN folded), merged bias ----
    y3 = jnp.dot(y2.astype(cdt), w3_ref[...], preferred_element_type=f32)
    y3 = y3 + jnp.dot(xm, wr_ref[...], preferred_element_type=f32)
    out = jnp.maximum(y3 + b3_ref[...], 0.0)
    out_ref[0] = out.reshape(TH, W, Cout).astype(out_ref.dtype)


# ---------------------------------------------------------------------------
# VMEM accounting helpers (generation aware)
# ---------------------------------------------------------------------------
def _rup(x, m):
    return -(-x // m) * m


def _padded_bytes(shape, dtype):
    """VMEM bytes of an array/block after (sublane, 128-lane) tiling."""
    isz = jnp.dtype(dtype).itemsize
    sub = 8 * max(1, 4 // isz)          # 8 for f32, 16 for bf16
    if len(shape) == 1:
        lead, d0, d1 = 1, 1, shape[0]
    else:
        lead = 1
        for d in shape[:-2]:
            lead *= d
        d0, d1 = shape[-2], shape[-1]
    return lead * _rup(max(d0, 1), sub) * _rup(max(d1, 1), 128) * isz


def _vmem_capacity_bytes():
    try:
        info = pltpu.get_tpu_info()
        for attr in ("vmem_capacity_bytes", "vmem_bytes", "vmem_size_bytes"):
            v = getattr(info, attr, None)
            if v:
                return int(v)
    except Exception:
        pass
    return 64 * 1024 * 1024             # conservative (v7x per-TC VMEM)


def _pick_row_tile(N, H, W, cin, c, cout, cdt, out_dtype, budget_bytes):
    """Largest divisor of H whose honest working set fits the budget and (if
    possible) gives the grid >= 4 steps (pipelining / both v7x cores)."""
    divisors = [d for d in range(H, 0, -1) if H % d == 0]

    def footprint(th):
        db = 2  # double buffering
        x_in = db * (_padded_bytes((1, th, W, cin), cdt)
                     + 2 * _padded_bytes((1, 1, W, cin), cdt))
        outs = db * (_padded_bytes((1, th, W, cout), out_dtype)
                     + _padded_bytes((1, th, W, c), out_dtype))
        wgt = db * (_padded_bytes((cin, c), cdt)
                    + _padded_bytes((9 * c, c), cdt)
                    + _padded_bytes((c, cout), cdt)
                    + _padded_bytes((cin, cout), cdt)
                    + 2 * _padded_bytes((1, c), jnp.float32)
                    + _padded_bytes((1, cout), jnp.float32))
        scratch = _padded_bytes((th + 2, W + 2, c), cdt)
        live = (_padded_bytes(((th + 2) * W, c), jnp.float32)     # h1
                + _padded_bytes((th * W, c), jnp.float32)         # conv2 acc
                + _padded_bytes((th * W, cout), jnp.float32))     # stage-3 acc
        return x_in + outs + wgt + scratch + live

    fitting = [d for d in divisors if footprint(d) <= budget_bytes] or [divisors[-1]]
    enough = [d for d in fitting if N * (H // d) >= 4]
    return max(enough) if enough else max(fitting)


# ---------------------------------------------------------------------------
# Wrapper
# ---------------------------------------------------------------------------
def conv_block_forward(x_nchw, p, return_x_2=True,
                       compute_dtype=jnp.float32, out_dtype=None):
    N, Cin, H, W = x_nchw.shape
    c = p['w1'].shape[1]
    Cout = p['w3'].shape[1]
    cdt = compute_dtype
    if out_dtype is None:
        out_dtype = x_nchw.dtype

    # NCHW -> NHWC glue (cast here so HBM reads of x are already narrow).
    x = jnp.transpose(x_nchw, (0, 2, 3, 1)).astype(cdt)

    # Fold BN scale into the conv weights; BN bias stays an f32 epilogue add.
    # Stage-3 + residual biases are merged (single add in the kernel).
    w1s = (p['w1'] * p['s1']).astype(cdt)          # (Cin, c)
    w2s = (p['w2f'] * p['s2']).astype(cdt)         # (9c, c), tap-major
    w3s = (p['w3'] * p['s3']).astype(cdt)          # (c, Cout)
    wrs = (p['wres'] * p['sres']).astype(cdt)      # (Cin, Cout)
    b1 = p['b1'].astype(jnp.float32)
    b2 = p['b2'].astype(jnp.float32)
    b3r = (p['b3'] + p['bres']).astype(jnp.float32)

    vmem_cap = _vmem_capacity_bytes()
    vmem_limit = int(min((vmem_cap * 3) // 4, 100 * 1024 * 1024))
    TH = _pick_row_tile(N, H, W, Cin, c, Cout, cdt, out_dtype,
                        budget_bytes=int(vmem_limit * 0.6))
    nH = H // TH

    kernel = functools.partial(_convblock_kernel, TH=TH, W=W, Cin=Cin, c=c,
                               Cout=Cout, cdt=cdt)

    def _const_spec(shape):
        return pl.BlockSpec(shape, lambda n, r: (0,) * len(shape))

    out, x2 = pl.pallas_call(
        kernel,
        out_shape=(jax.ShapeDtypeStruct((N, H, W, Cout), out_dtype),
                   jax.ShapeDtypeStruct((N, H, W, c), out_dtype)),
        grid=(N, nH),
        in_specs=[
            # x: single-row top halo, main TH-row block, single-row bottom
            # halo (halo indices clamped; out-of-image rows zeroed in-kernel).
            pl.BlockSpec((1, 1, W, Cin),
                         lambda n, r: (n, jnp.maximum(r * TH - 1, 0), 0, 0)),
            pl.BlockSpec((1, TH, W, Cin), lambda n, r: (n, r, 0, 0)),
            pl.BlockSpec((1, 1, W, Cin),
                         lambda n, r: (n, jnp.minimum((r + 1) * TH, H - 1), 0, 0)),
            _const_spec((Cin, c)), _const_spec((1, c)),
            _const_spec((9 * c, c)), _const_spec((1, c)),
            _const_spec((c, Cout)), _const_spec((Cin, Cout)),
            _const_spec((1, Cout)),
        ],
        out_specs=(pl.BlockSpec((1, TH, W, Cout), lambda n, r: (n, r, 0, 0)),
                   pl.BlockSpec((1, TH, W, c), lambda n, r: (n, r, 0, 0))),
        scratch_shapes=[pltpu.VMEM((TH + 2, W + 2, c), cdt)],   # padded h1
        compiler_params=pltpu.CompilerParams(
            dimension_semantics=("parallel", "parallel"),
            vmem_limit_bytes=vmem_limit),
    )(x, x, x,
      w1s, b1, w2s, b2, w3s, wrs, b3r)

    out_nchw = jnp.transpose(out, (0, 3, 1, 2))
    x2_nchw = jnp.transpose(x2, (0, 3, 1, 2))
    if return_x_2:
        return out_nchw, x2_nchw
    return out_nchw


# ---------------------------------------------------------------------------
# Parameter construction + pure-JAX reference (for verification)
# ---------------------------------------------------------------------------
EPS = 1e-6   # matches norm_layer=partial(nn.BatchNorm2d, eps=1e-06)


def _make_bn(key, C):
    k1, k2, k3, k4 = jax.random.split(key, 4)
    gamma = 1.0 + 0.1 * jax.random.normal(k1, (C,), jnp.float32)
    beta = 0.1 * jax.random.normal(k2, (C,), jnp.float32)
    mean = 0.1 * jax.random.normal(k3, (C,), jnp.float32)
    var = 0.5 + jnp.abs(jax.random.normal(k4, (C,), jnp.float32))
    return gamma, beta, mean, var


def _fold_bn(gamma, beta, mean, var):
    scale = gamma / jnp.sqrt(var + EPS)
    bias = beta - mean * scale
    return scale[None, :], bias[None, :]


def make_params(key, in_channels, out_channels):
    c = out_channels // 4
    ks = jax.random.split(key, 8)
    w1 = 0.1 * jax.random.normal(ks[0], (in_channels, c), jnp.float32)
    w2 = 0.1 * jax.random.normal(ks[1], (3, 3, c, c), jnp.float32)
    w3 = 0.1 * jax.random.normal(ks[2], (c, out_channels), jnp.float32)
    wres = 0.1 * jax.random.normal(ks[3], (in_channels, out_channels), jnp.float32)
    bn1, bn2, bn3, bnr = (_make_bn(ks[4], c), _make_bn(ks[5], c),
                          _make_bn(ks[6], out_channels), _make_bn(ks[7], out_channels))
    s1, b1 = _fold_bn(*bn1)
    s2, b2 = _fold_bn(*bn2)
    s3, b3 = _fold_bn(*bn3)
    sr, br = _fold_bn(*bnr)
    params = dict(w1=w1, s1=s1, b1=b1,
                  w2f=w2.reshape(9 * c, c), s2=s2, b2=b2,
                  w3=w3, s3=s3, b3=b3,
                  wres=wres, sres=sr, bres=br)
    raw = dict(w1=w1, w2=w2, w3=w3, wres=wres,
               bn1=bn1, bn2=bn2, bn3=bn3, bnr=bnr)
    return params, raw


def _ref_conv(x_nchw, w_oihw, padding):
    return lax.conv_general_dilated(
        x_nchw, w_oihw, window_strides=(1, 1), padding=padding,
        dimension_numbers=('NCHW', 'OIHW', 'NCHW'))


def _ref_bn(x_nchw, bn):
    gamma, beta, mean, var = bn
    inv = gamma / jnp.sqrt(var + EPS)
    return (x_nchw - mean[None, :, None, None]) * inv[None, :, None, None] \
        + beta[None, :, None, None]


def reference_forward(x_nchw, raw):
    w1 = jnp.transpose(raw['w1'])[:, :, None, None]
    w2 = jnp.transpose(raw['w2'], (3, 2, 0, 1))
    w3 = jnp.transpose(raw['w3'])[:, :, None, None]
    wr = jnp.transpose(raw['wres'])[:, :, None, None]
    h = jax.nn.relu(_ref_bn(_ref_conv(x_nchw, w1, [(0, 0), (0, 0)]), raw['bn1']))
    x2 = jax.nn.relu(_ref_bn(_ref_conv(h, w2, [(1, 1), (1, 1)]), raw['bn2']))
    h = _ref_bn(_ref_conv(x2, w3, [(0, 0), (0, 0)]), raw['bn3'])
    res = _ref_bn(_ref_conv(x_nchw, wr, [(0, 0), (0, 0)]), raw['bnr'])
    return jax.nn.relu(h + res), x2


# ---------------------------------------------------------------------------
if __name__ == "__main__":
    N, IN_C, OUT_C, H, W = 2, 8, 32, 16, 16    # c = OUT_C // 4 = 8

    key = jax.random.PRNGKey(0)
    kx, kp = jax.random.split(key)
    x = jax.random.normal(kx, (N, IN_C, H, W), jnp.float32)   # NCHW like PyTorch
    params, raw = make_params(kp, IN_C, OUT_C)

    ref_out, ref_x2 = reference_forward(x, raw)

    # f32 matmul path (tight correctness check)
    fwd32 = jax.jit(functools.partial(conv_block_forward, return_x_2=True,
                                      compute_dtype=jnp.float32))
    out, x2 = fwd32(x, params)
    jax.block_until_ready((out, x2))
    assert out.shape == (N, OUT_C, H, W) and x2.shape == (N, OUT_C // 4, H, W)
    assert jnp.allclose(out, ref_out, atol=1e-3, rtol=1e-3)
    assert jnp.allclose(x2, ref_x2, atol=1e-3, rtol=1e-3)

    # bf16 matmul inputs + bf16 outputs, f32 accumulate/epilogue (perf path)
    fwd16 = jax.jit(functools.partial(conv_block_forward, return_x_2=True,
                                      compute_dtype=jnp.bfloat16,
                                      out_dtype=jnp.bfloat16))
    out_b, x2_b = fwd16(x, params)
    jax.block_until_ready((out_b, x2_b))
    assert jnp.allclose(out_b.astype(jnp.float32), ref_out, atol=1e-1, rtol=1e-1)
    assert jnp.allclose(x2_b.astype(jnp.float32), ref_x2, atol=1e-1, rtol=1e-1)

    print("KERNEL_OK")
</pallas_src>

<mosaic_0001>
module attributes {stable_mosaic.version = 11 : i64} {
  func.func @_convblock_kernel(%arg0: i32, %arg1: i32, %arg2: memref<1x1x16x8xf32, #tpu.memory_space<vmem>>, %arg3: memref<1x8x16x8xf32, #tpu.memory_space<vmem>>, %arg4: memref<1x1x16x8xf32, #tpu.memory_space<vmem>>, %arg5: memref<8x8xf32, #tpu.memory_space<vmem>>, %arg6: memref<1x8xf32, #tpu.memory_space<vmem>>, %arg7: memref<72x8xf32, #tpu.memory_space<vmem>>, %arg8: memref<1x8xf32, #tpu.memory_space<vmem>>, %arg9: memref<8x32xf32, #tpu.memory_space<vmem>>, %arg10: memref<8x32xf32, #tpu.memory_space<vmem>>, %arg11: memref<1x32xf32, #tpu.memory_space<vmem>>, %arg12: memref<1x8x16x32xf32, #tpu.memory_space<vmem>>, %arg13: memref<1x8x16x8xf32, #tpu.memory_space<vmem>>, %arg14: memref<10x18x8xf32, #tpu.memory_space<vmem>>) attributes {dimension_semantics = [#tpu.dimension_semantics<parallel>, #tpu.dimension_semantics<parallel>], iteration_bounds = array<i64: 2, 2>, scalar_prefetch = 0 : i64, scratch_operands = 1 : i64, tpu.core_type = #tpu.core_type<tc>, window_params = [{transform_indices = @transform_0, window_bounds = array<i64: 1, 1, 16, 8>}, {transform_indices = @transform_1, window_bounds = array<i64: 1, 8, 16, 8>}, {transform_indices = @transform_2, window_bounds = array<i64: 1, 1, 16, 8>}, {pipeline_mode = #tpu.pipeline_mode<synchronous>, transform_indices = @transform_3, window_bounds = array<i64: 8, 8>}, {pipeline_mode = #tpu.pipeline_mode<synchronous>, transform_indices = @transform_4, window_bounds = array<i64: 1, 8>}, {pipeline_mode = #tpu.pipeline_mode<synchronous>, transform_indices = @transform_5, window_bounds = array<i64: 72, 8>}, {pipeline_mode = #tpu.pipeline_mode<synchronous>, transform_indices = @transform_6, window_bounds = array<i64: 1, 8>}, {pipeline_mode = #tpu.pipeline_mode<synchronous>, transform_indices = @transform_7, window_bounds = array<i64: 8, 32>}, {pipeline_mode = #tpu.pipeline_mode<synchronous>, transform_indices = @transform_8, window_bounds = array<i64: 8, 32>}, {pipeline_mode = #tpu.pipeline_mode<synchronous>, transform_indices = @transform_9, window_bounds = array<i64: 1, 32>}, {transform_indices = @transform_10, window_bounds = array<i64: 1, 8, 16, 32>}, {transform_indices = @transform_11, window_bounds = array<i64: 1, 8, 16, 8>}]} {
    %c0 = arith.constant 0 : index
    %c0_0 = arith.constant 0 : index
    %0 = vector.load %arg5[%c0, %c0_0] : memref<8x8xf32, #tpu.memory_space<vmem>>, vector<8x8xf32>
    %c0_1 = arith.constant 0 : index
    %c0_2 = arith.constant 0 : index
    %1 = vector.load %arg6[%c0_1, %c0_2] : memref<1x8xf32, #tpu.memory_space<vmem>>, vector<1x8xf32>
    %cst = arith.constant 0.000000e+00 : f32
    %2 = vector.broadcast %cst : f32 to vector<10x1x8xf32>
    %c0_3 = arith.constant 0 : index
    %c0_4 = arith.constant 0 : index
    %c0_5 = arith.constant 0 : index
    %3 = vector.load %arg14[%c0_3, %c0_4, %c0_5] : memref<10x18x8xf32, #tpu.memory_space<vmem>>, vector<10x1x8xf32>
    tpu.vector_store %arg14[%c0_3, %c0_4, %c0_5], %2 {strides = array<i32>} : memref<10x18x8xf32, #tpu.memory_space<vmem>>, vector<10x1x8xf32>,
    %c0_6 = arith.constant 0 : index
    %c17 = arith.constant 17 : index
    %c0_7 = arith.constant 0 : index
    %4 = vector.load %arg14[%c0_6, %c17, %c0_7] : memref<10x18x8xf32, #tpu.memory_space<vmem>>, vector<10x1x8xf32>
    tpu.vector_store %arg14[%c0_6, %c17, %c0_7], %2 {strides = array<i32>} : memref<10x18x8xf32, #tpu.memory_space<vmem>>, vector<10x1x8xf32>,
    %c0_8 = arith.constant 0 : index
    %c0_9 = arith.constant 0 : index
    %c0_10 = arith.constant 0 : index
    %c0_11 = arith.constant 0 : index
    %5 = vector.load %arg3[%c0_8, %c0_9, %c0_10, %c0_11] : memref<1x8x16x8xf32, #tpu.memory_space<vmem>>, vector<1x8x16x8xf32>
    %6 = vector.shape_cast %5 : vector<1x8x16x8xf32> to vector<8x16x8xf32>
    %7 = vector.shape_cast %6 : vector<8x16x8xf32> to vector<128x8xf32>
    %cst_12 = arith.constant dense<0.000000e+00> : vector<128x8xf32>
    %8 = tpu.matmul %7, %0, %cst_12 {dimension_numbers = #tpu.dot_dimension_numbers<[1], [0], [0], [1], [0, 0, 1, 1], [], []>} : vector<128x8xf32>, vector<8x8xf32>, vector<128x8xf32> -> vector<128x8xf32>
    %9 = vector.broadcast %1 : vector<1x8xf32> to vector<128x8xf32>
    %10 = arith.addf %8, %9 : vector<128x8xf32>
    %cst_13 = arith.constant 0.000000e+00 : f32
    %11 = vector.broadcast %cst_13 : f32 to vector<128x8xf32>
    %12 = arith.maximumf %10, %11 : vector<128x8xf32>
    %13 = vector.shape_cast %12 : vector<128x8xf32> to vector<8x16x8xf32>
    %c1 = arith.constant 1 : index
    %c1_14 = arith.constant 1 : index
    %c0_15 = arith.constant 0 : index
    %14 = vector.load %arg14[%c1, %c1_14, %c0_15] : memref<10x18x8xf32, #tpu.memory_space<vmem>>, vector<8x16x8xf32>
    tpu.vector_store %arg14[%c1, %c1_14, %c0_15], %13 {strides = array<i32>} : memref<10x18x8xf32, #tpu.memory_space<vmem>>, vector<8x16x8xf32>,
    %c0_i32 = arith.constant 0 : i32
    %15 = arith.cmpi sgt, %arg1, %c0_i32 : i32
    %cst_16 = arith.constant 1.000000e+00 : f32
    %cst_17 = arith.constant 0.000000e+00 : f32
    %16 = arith.select %15, %cst_16, %cst_17 : f32
    %c1_i32 = arith.constant 1 : i32
    %17 = arith.cmpi slt, %arg1, %c1_i32 : i32
    %cst_18 = arith.constant 1.000000e+00 : f32
    %cst_19 = arith.constant 0.000000e+00 : f32
    %18 = arith.select %17, %cst_18, %cst_19 : f32
    %c0_20 = arith.constant 0 : index
    %c0_21 = arith.constant 0 : index
    %c0_22 = arith.constant 0 : index
    %c0_23 = arith.constant 0 : index
    %19 = vector.load %arg2[%c0_20, %c0_21, %c0_22, %c0_23] : memref<1x1x16x8xf32, #tpu.memory_space<vmem>>, vector<1x1x16x8xf32>
    %20 = vector.shape_cast %19 : vector<1x1x16x8xf32> to vector<1x16x8xf32>
    %21 = vector.shape_cast %20 : vector<1x16x8xf32> to vector<16x8xf32>
    %cst_24 = arith.constant dense<0.000000e+00> : vector<16x8xf32>
    %22 = tpu.matmul %21, %0, %cst_24 {dimension_numbers = #tpu.dot_dimension_numbers<[1], [0], [0], [1], [0, 0, 1, 1], [], []>} : vector<16x8xf32>, vector<8x8xf32>, vector<16x8xf32> -> vector<16x8xf32>
    %23 = vector.broadcast %1 : vector<1x8xf32> to vector<16x8xf32>
    %24 = arith.addf %22, %23 : vector<16x8xf32>
    %cst_25 = arith.constant 0.000000e+00 : f32
    %25 = vector.broadcast %cst_25 : f32 to vector<16x8xf32>
    %26 = arith.maximumf %24, %25 : vector<16x8xf32>
    %27 = vector.broadcast %16 : f32 to vector<16x8xf32>
    %28 = arith.mulf %26, %27 : vector<16x8xf32>
    %c0_26 = arith.constant 0 : index
    %c0_27 = arith.constant 0 : index
    %c0_28 = arith.constant 0 : index
    %c0_29 = arith.constant 0 : index
    %29 = vector.load %arg4[%c0_26, %c0_27, %c0_28, %c0_29] : memref<1x1x16x8xf32, #tpu.memory_space<vmem>>, vector<1x1x16x8xf32>
    %30 = vector.shape_cast %29 : vector<1x1x16x8xf32> to vector<1x16x8xf32>
    %31 = vector.shape_cast %30 : vector<1x16x8xf32> to vector<16x8xf32>
    %cst_30 = arith.constant dense<0.000000e+00> : vector<16x8xf32>
    %32 = tpu.matmul %31, %0, %cst_30 {dimension_numbers = #tpu.dot_dimension_numbers<[1], [0], [0], [1], [0, 0, 1, 1], [], []>} : vector<16x8xf32>, vector<8x8xf32>, vector<16x8xf32> -> vector<16x8xf32>
    %33 = vector.broadcast %1 : vector<1x8xf32> to vector<16x8xf32>
    %34 = arith.addf %32, %33 : vector<16x8xf32>
    %cst_31 = arith.constant 0.000000e+00 : f32
    %35 = vector.broadcast %cst_31 : f32 to vector<16x8xf32>
    %36 = arith.maximumf %34, %35 : vector<16x8xf32>
    %37 = vector.broadcast %18 : f32 to vector<16x8xf32>
    %38 = arith.mulf %36, %37 : vector<16x8xf32>
    %39 = vector.shape_cast %28 : vector<16x8xf32> to vector<1x16x8xf32>
    %c0_32 = arith.constant 0 : index
    %c1_33 = arith.constant 1 : index
    %c0_34 = arith.constant 0 : index
    %40 = vector.load %arg14[%c0_32, %c1_33, %c0_34] : memref<10x18x8xf32, #tpu.memory_space<vmem>>, vector<1x16x8xf32>
    tpu.vector_store %arg14[%c0_32, %c1_33, %c0_34], %39 {strides = array<i32>} : memref<10x18x8xf32, #tpu.memory_space<vmem>>, vector<1x16x8xf32>,
    %41 = vector.shape_cast %38 : vector<16x8xf32> to vector<1x16x8xf32>
    %c9 = arith.constant 9 : index
    %c1_35 = arith.constant 1 : index
    %c0_36 = arith.constant 0 : index
    %42 = vector.load %arg14[%c9, %c1_35, %c0_36] : memref<10x18x8xf32, #tpu.memory_space<vmem>>, vector<1x16x8xf32>
    tpu.vector_store %arg14[%c9, %c1_35, %c0_36], %41 {strides = array<i32>} : memref<10x18x8xf32, #tpu.memory_space<vmem>>, vector<1x16x8xf32>,
    %cst_37 = arith.constant 0.000000e+00 : f32
    %43 = vector.broadcast %cst_37 : f32 to vector<128x8xf32>
    %c0_38 = arith.constant 0 : index
    %c0_39 = arith.constant 0 : index
    %c0_40 = arith.constant 0 : index
    %44 = vector.load %arg14[%c0_38, %c0_39, %c0_40] : memref<10x18x8xf32, #tpu.memory_space<vmem>>, vector<8x16x8xf32>
    %45 = vector.shape_cast %44 : vector<8x16x8xf32> to vector<128x8xf32>
    %c0_41 = arith.constant 0 : index
    %c0_42 = arith.constant 0 : index
    %46 = vector.load %arg7[%c0_41, %c0_42] : memref<72x8xf32, #tpu.memory_space<vmem>>, vector<8x8xf32>
    %cst_43 = arith.constant dense<0.000000e+00> : vector<128x8xf32>
    %47 = tpu.matmul %45, %46, %cst_43 {dimension_numbers = #tpu.dot_dimension_numbers<[1], [0], [0], [1], [0, 0, 1, 1], [], []>} : vector<128x8xf32>, vector<8x8xf32>, vector<128x8xf32> -> vector<128x8xf32>
    %48 = arith.addf %43, %47 : vector<128x8xf32>
    %c0_44 = arith.constant 0 : index
    %c1_45 = arith.constant 1 : index
    %c0_46 = arith.constant 0 : index
    %49 = vector.load %arg14[%c0_44, %c1_45, %c0_46] : memref<10x18x8xf32, #tpu.memory_space<vmem>>, vector<8x16x8xf32>
    %50 = vector.shape_cast %49 : vector<8x16x8xf32> to vector<128x8xf32>
    %c8 = arith.constant 8 : index
    %c0_47 = arith.constant 0 : index
    %51 = vector.load %arg7[%c8, %c0_47] : memref<72x8xf32, #tpu.memory_space<vmem>>, vector<8x8xf32>
    %cst_48 = arith.constant dense<0.000000e+00> : vector<128x8xf32>
    %52 = tpu.matmul %50, %51, %cst_48 {dimension_numbers = #tpu.dot_dimension_numbers<[1], [0], [0], [1], [0, 0, 1, 1], [], []>} : vector<128x8xf32>, vector<8x8xf32>, vector<128x8xf32> -> vector<128x8xf32>
    %53 = arith.addf %48, %52 : vector<128x8xf32>
    %c0_49 = arith.constant 0 : index
    %c2 = arith.constant 2 : index
    %c0_50 = arith.constant 0 : index
    %54 = vector.load %arg14[%c0_49, %c2, %c0_50] : memref<10x18x8xf32, #tpu.memory_space<vmem>>, vector<8x16x8xf32>
    %55 = vector.shape_cast %54 : vector<8x16x8xf32> to vector<128x8xf32>
    %c16 = arith.constant 16 : index
    %c0_51 = arith.constant 0 : index
    %56 = vector.load %arg7[%c16, %c0_51] : memref<72x8xf32, #tpu.memory_space<vmem>>, vector<8x8xf32>
    %cst_52 = arith.constant dense<0.000000e+00> : vector<128x8xf32>
    %57 = tpu.matmul %55, %56, %cst_52 {dimension_numbers = #tpu.dot_dimension_numbers<[1], [0], [0], [1], [0, 0, 1, 1], [], []>} : vector<128x8xf32>, vector<8x8xf32>, vector<128x8xf32> -> vector<128x8xf32>
    %58 = arith.addf %53, %57 : vector<128x8xf32>
    %c1_53 = arith.constant 1 : index
    %c0_54 = arith.constant 0 : index
    %c0_55 = arith.constant 0 : index
    %59 = vector.load %arg14[%c1_53, %c0_54, %c0_55] : memref<10x18x8xf32, #tpu.memory_space<vmem>>, vector<8x16x8xf32>
    %60 = vector.shape_cast %59 : vector<8x16x8xf32> to vector<128x8xf32>
    %c24 = arith.constant 24 : index
    %c0_56 = arith.constant 0 : index
    %61 = vector.load %arg7[%c24, %c0_56] : memref<72x8xf32, #tpu.memory_space<vmem>>, vector<8x8xf32>
    %cst_57 = arith.constant dense<0.000000e+00> : vector<128x8xf32>
    %62 = tpu.matmul %60, %61, %cst_57 {dimension_numbers = #tpu.dot_dimension_numbers<[1], [0], [0], [1], [0, 0, 1, 1], [], []>} : vector<128x8xf32>, vector<8x8xf32>, vector<128x8xf32> -> vector<128x8xf32>
    %63 = arith.addf %58, %62 : vector<128x8xf32>
    %c1_58 = arith.constant 1 : index
    %c1_59 = arith.constant 1 : index
    %c0_60 = arith.constant 0 : index
    %64 = vector.load %arg14[%c1_58, %c1_59, %c0_60] : memref<10x18x8xf32, #tpu.memory_space<vmem>>, vector<8x16x8xf32>
    %65 = vector.shape_cast %64 : vector<8x16x8xf32> to vector<128x8xf32>
    %c32 = arith.constant 32 : index
    %c0_61 = arith.constant 0 : index
    %66 = vector.load %arg7[%c32, %c0_61] : memref<72x8xf32, #tpu.memory_space<vmem>>, vector<8x8xf32>
    %cst_62 = arith.constant dense<0.000000e+00> : vector<128x8xf32>
    %67 = tpu.matmul %65, %66, %cst_62 {dimension_numbers = #tpu.dot_dimension_numbers<[1], [0], [0], [1], [0, 0, 1, 1], [], []>} : vector<128x8xf32>, vector<8x8xf32>, vector<128x8xf32> -> vector<128x8xf32>
    %68 = arith.addf %63, %67 : vector<128x8xf32>
    %c1_63 = arith.constant 1 : index
    %c2_64 = arith.constant 2 : index
    %c0_65 = arith.constant 0 : index
    %69 = vector.load %arg14[%c1_63, %c2_64, %c0_65] : memref<10x18x8xf32, #tpu.memory_space<vmem>>, vector<8x16x8xf32>
    %70 = vector.shape_cast %69 : vector<8x16x8xf32> to vector<128x8xf32>
    %c40 = arith.constant 40 : index
    %c0_66 = arith.constant 0 : index
    %71 = vector.load %arg7[%c40, %c0_66] : memref<72x8xf32, #tpu.memory_space<vmem>>, vector<8x8xf32>
    %cst_67 = arith.constant dense<0.000000e+00> : vector<128x8xf32>
    %72 = tpu.matmul %70, %71, %cst_67 {dimension_numbers = #tpu.dot_dimension_numbers<[1], [0], [0], [1], [0, 0, 1, 1], [], []>} : vector<128x8xf32>, vector<8x8xf32>, vector<128x8xf32> -> vector<128x8xf32>
    %73 = arith.addf %68, %72 : vector<128x8xf32>
    %c2_68 = arith.constant 2 : index
    %c0_69 = arith.constant 0 : index
    %c0_70 = arith.constant 0 : index
    %74 = vector.load %arg14[%c2_68, %c0_69, %c0_70] : memref<10x18x8xf32, #tpu.memory_space<vmem>>, vector<8x16x8xf32>
    %75 = vector.shape_cast %74 : vector<8x16x8xf32> to vector<128x8xf32>
    %c48 = arith.constant 48 : index
    %c0_71 = arith.constant 0 : index
    %76 = vector.load %arg7[%c48, %c0_71] : memref<72x8xf32, #tpu.memory_space<vmem>>, vector<8x8xf32>
    %cst_72 = arith.constant dense<0.000000e+00> : vector<128x8xf32>
    %77 = tpu.matmul %75, %76, %cst_72 {dimension_numbers = #tpu.dot_dimension_numbers<[1], [0], [0], [1], [0, 0, 1, 1], [], []>} : vector<128x8xf32>, vector<8x8xf32>, vector<128x8xf32> -> vector<128x8xf32>
    %78 = arith.addf %73, %77 : vector<128x8xf32>
    %c2_73 = arith.constant 2 : index
    %c1_74 = arith.constant 1 : index
    %c0_75 = arith.constant 0 : index
    %79 = vector.load %arg14[%c2_73, %c1_74, %c0_75] : memref<10x18x8xf32, #tpu.memory_space<vmem>>, vector<8x16x8xf32>
    %80 = vector.shape_cast %79 : vector<8x16x8xf32> to vector<128x8xf32>
    %c56 = arith.constant 56 : index
    %c0_76 = arith.constant 0 : index
    %81 = vector.load %arg7[%c56, %c0_76] : memref<72x8xf32, #tpu.memory_space<vmem>>, vector<8x8xf32>
    %cst_77 = arith.constant dense<0.000000e+00> : vector<128x8xf32>
    %82 = tpu.matmul %80, %81, %cst_77 {dimension_numbers = #tpu.dot_dimension_numbers<[1], [0], [0], [1], [0, 0, 1, 1], [], []>} : vector<128x8xf32>, vector<8x8xf32>, vector<128x8xf32> -> vector<128x8xf32>
    %83 = arith.addf %78, %82 : vector<128x8xf32>
    %c2_78 = arith.constant 2 : index
    %c2_79 = arith.constant 2 : index
    %c0_80 = arith.constant 0 : index
    %84 = vector.load %arg14[%c2_78, %c2_79, %c0_80] : memref<10x18x8xf32, #tpu.memory_space<vmem>>, vector<8x16x8xf32>
    %85 = vector.shape_cast %84 : vector<8x16x8xf32> to vector<128x8xf32>
    %c64 = arith.constant 64 : index
    %c0_81 = arith.constant 0 : index
    %86 = vector.load %arg7[%c64, %c0_81] : memref<72x8xf32, #tpu.memory_space<vmem>>, vector<8x8xf32>
    %cst_82 = arith.constant dense<0.000000e+00> : vector<128x8xf32>
    %87 = tpu.matmul %85, %86, %cst_82 {dimension_numbers = #tpu.dot_dimension_numbers<[1], [0], [0], [1], [0, 0, 1, 1], [], []>} : vector<128x8xf32>, vector<8x8xf32>, vector<128x8xf32> -> vector<128x8xf32>
    %88 = arith.addf %83, %87 : vector<128x8xf32>
    %c0_83 = arith.constant 0 : index
    %c0_84 = arith.constant 0 : index
    %89 = vector.load %arg8[%c0_83, %c0_84] : memref<1x8xf32, #tpu.memory_space<vmem>>, vector<1x8xf32>
    %90 = vector.broadcast %89 : vector<1x8xf32> to vector<128x8xf32>
    %91 = arith.addf %88, %90 : vector<128x8xf32>
    %cst_85 = arith.constant 0.000000e+00 : f32
    %92 = vector.broadcast %cst_85 : f32 to vector<128x8xf32>
    %93 = arith.maximumf %91, %92 : vector<128x8xf32>
    %94 = vector.shape_cast %93 : vector<128x8xf32> to vector<8x16x8xf32>
    %c0_86 = arith.constant 0 : index
    %c0_87 = arith.constant 0 : index
    %c0_88 = arith.constant 0 : index
    %c0_89 = arith.constant 0 : index
    %95 = vector.load %arg13[%c0_86, %c0_87, %c0_88, %c0_89] : memref<1x8x16x8xf32, #tpu.memory_space<vmem>>, vector<1x8x16x8xf32>
    %96 = vector.shape_cast %95 : vector<1x8x16x8xf32> to vector<8x16x8xf32>
    %97 = vector.shape_cast %94 : vector<8x16x8xf32> to vector<1x8x16x8xf32>
    tpu.vector_store %arg13[%c0_86, %c0_87, %c0_88, %c0_89], %97 {strides = array<i32>} : memref<1x8x16x8xf32, #tpu.memory_space<vmem>>, vector<1x8x16x8xf32>,
    %c0_90 = arith.constant 0 : index
    %c0_91 = arith.constant 0 : index
    %98 = vector.load %arg9[%c0_90, %c0_91] : memref<8x32xf32, #tpu.memory_space<vmem>>, vector<8x32xf32>
    %cst_92 = arith.constant dense<0.000000e+00> : vector<128x32xf32>
    %99 = tpu.matmul %93, %98, %cst_92 {dimension_numbers = #tpu.dot_dimension_numbers<[1], [0], [0], [1], [0, 0, 1, 1], [], []>} : vector<128x8xf32>, vector<8x32xf32>, vector<128x32xf32> -> vector<128x32xf32>
    %c0_93 = arith.constant 0 : index
    %c0_94 = arith.constant 0 : index
    %100 = vector.load %arg10[%c0_93, %c0_94] : memref<8x32xf32, #tpu.memory_space<vmem>>, vector<8x32xf32>
    %cst_95 = arith.constant dense<0.000000e+00> : vector<128x32xf32>
    %101 = tpu.matmul %7, %100, %cst_95 {dimension_numbers = #tpu.dot_dimension_numbers<[1], [0], [0], [1], [0, 0, 1, 1], [], []>} : vector<128x8xf32>, vector<8x32xf32>, vector<128x32xf32> -> vector<128x32xf32>
    %102 = arith.addf %99, %101 : vector<128x32xf32>
    %c0_96 = arith.constant 0 : index
    %c0_97 = arith.constant 0 : index
    %103 = vector.load %arg11[%c0_96, %c0_97] : memref<1x32xf32, #tpu.memory_space<vmem>>, vector<1x32xf32>
    %104 = vector.broadcast %103 : vector<1x32xf32> to vector<128x32xf32>
    %105 = arith.addf %102, %104 : vector<128x32xf32>
    %cst_98 = arith.constant 0.000000e+00 : f32
    %106 = vector.broadcast %cst_98 : f32 to vector<128x32xf32>
    %107 = arith.maximumf %105, %106 : vector<128x32xf32>
    %108 = vector.shape_cast %107 : vector<128x32xf32> to vector<8x16x32xf32>
    %c0_99 = arith.constant 0 : index
    %c0_100 = arith.constant 0 : index
    %c0_101 = arith.constant 0 : index
    %c0_102 = arith.constant 0 : index
    %109 = vector.load %arg12[%c0_99, %c0_100, %c0_101, %c0_102] : memref<1x8x16x32xf32, #tpu.memory_space<vmem>>, vector<1x8x16x32xf32>
    %110 = vector.shape_cast %109 : vector<1x8x16x32xf32> to vector<8x16x32xf32>
    %111 = vector.shape_cast %108 : vector<8x16x32xf32> to vector<1x8x16x32xf32>
    tpu.vector_store %arg12[%c0_99, %c0_100, %c0_101, %c0_102], %111 {strides = array<i32>} : memref<1x8x16x32xf32, #tpu.memory_space<vmem>>, vector<1x8x16x32xf32>,
    return
  }
  func.func @transform_0(%arg0: i32, %arg1: i32) -> (i32, i32, i32, i32) {
    %c8_i32 = arith.constant 8 : i32
    %0 = arith.muli %arg1, %c8_i32 : i32
    %c1_i32 = arith.constant 1 : i32
    %1 = arith.subi %0, %c1_i32 : i32
    %c0_i32 = arith.constant 0 : i32
    %2 = arith.maxsi %1, %c0_i32 : i32
    %c0_i32_0 = arith.constant 0 : i32
    %c0_i32_1 = arith.constant 0 : i32
    %c0_i32_2 = arith.constant 0 : i32
    return %arg0, %2, %c0_i32_0, %c0_i32_1 : i32, i32, i32, i32
  }
  func.func @transform_1(%arg0: i32, %arg1: i32) -> (i32, i32, i32, i32) {
    %c0_i32 = arith.constant 0 : i32
    %c0_i32_0 = arith.constant 0 : i32
    %c0_i32_1 = arith.constant 0 : i32
    return %arg0, %arg1, %c0_i32, %c0_i32_0 : i32, i32, i32, i32
  }
  func.func @transform_2(%arg0: i32, %arg1: i32) -> (i32, i32, i32, i32) {
    %c1_i32 = arith.constant 1 : i32
    %0 = arith.addi %arg1, %c1_i32 : i32
    %c8_i32 = arith.constant 8 : i32
    %1 = arith.muli %0, %c8_i32 : i32
    %c15_i32 = arith.constant 15 : i32
    %2 = arith.minsi %1, %c15_i32 : i32
    %c0_i32 = arith.constant 0 : i32
    %c0_i32_0 = arith.constant 0 : i32
    %c0_i32_1 = arith.constant 0 : i32
    return %arg0, %2, %c0_i32, %c0_i32_0 : i32, i32, i32, i32
  }
  func.func @transform_3(%arg0: i32, %arg1: i32) -> (i32, i32) {
    %c0_i32 = arith.constant 0 : i32
    %c0_i32_0 = arith.constant 0 : i32
    %c0_i32_1 = arith.constant 0 : i32
    return %c0_i32, %c0_i32_0 : i32, i32
  }
  func.func @transform_4(%arg0: i32, %arg1: i32) -> (i32, i32) {
    %c0_i32 = arith.constant 0 : i32
    %c0_i32_0 = arith.constant 0 : i32
    %c0_i32_1 = arith.constant 0 : i32
    return %c0_i32, %c0_i32_0 : i32, i32
  }
  func.func @transform_5(%arg0: i32, %arg1: i32) -> (i32, i32) {
    %c0_i32 = arith.constant 0 : i32
    %c0_i32_0 = arith.constant 0 : i32
    %c0_i32_1 = arith.constant 0 : i32
    return %c0_i32, %c0_i32_0 : i32, i32
  }
  func.func @transform_6(%arg0: i32, %arg1: i32) -> (i32, i32) {
    %c0_i32 = arith.constant 0 : i32
    %c0_i32_0 = arith.constant 0 : i32
    %c0_i32_1 = arith.constant 0 : i32
    return %c0_i32, %c0_i32_0 : i32, i32
  }
  func.func @transform_7(%arg0: i32, %arg1: i32) -> (i32, i32) {
    %c0_i32 = arith.constant 0 : i32
    %c0_i32_0 = arith.constant 0 : i32
    %c0_i32_1 = arith.constant 0 : i32
    return %c0_i32, %c0_i32_0 : i32, i32
  }
  func.func @transform_8(%arg0: i32, %arg1: i32) -> (i32, i32) {
    %c0_i32 = arith.constant 0 : i32
    %c0_i32_0 = arith.constant 0 : i32
    %c0_i32_1 = arith.constant 0 : i32
    return %c0_i32, %c0_i32_0 : i32, i32
  }
  func.func @transform_9(%arg0: i32, %arg1: i32) -> (i32, i32) {
    %c0_i32 = arith.constant 0 : i32
    %c0_i32_0 = arith.constant 0 : i32
    %c0_i32_1 = arith.constant 0 : i32
    return %c0_i32, %c0_i32_0 : i32, i32
  }
  func.func @transform_10(%arg0: i32, %arg1: i32) -> (i32, i32, i32, i32) {
    %c0_i32 = arith.constant 0 : i32
    %c0_i32_0 = arith.constant 0 : i32
    %c0_i32_1 = arith.constant 0 : i32
    return %arg0, %arg1, %c0_i32, %c0_i32_0 : i32, i32, i32, i32
  }
  func.func @transform_11(%arg0: i32, %arg1: i32) -> (i32, i32, i32, i32) {
    %c0_i32 = arith.constant 0 : i32
    %c0_i32_0 = arith.constant 0 : i32
    %c0_i32_1 = arith.constant 0 : i32
    return %arg0, %arg1, %c0_i32, %c0_i32_0 : i32, i32, i32, i32
  }
}

</mosaic_0001>

<bundles_post_ra>
// kernel: conv_block_forward.1
= control target key start
LH: loop header
LB: loop body
LE: loop exit
PB: predicated region body
PF: predicated region fallthrough
CT: control target
= control target key end

     0   :  { %s4119_s0 = inlined_call_operand.vmem [shape: f32[2,16,16,8], index: 0, kind: input, shape index: {}, may-alias: {0,1,2}]   ;;  %s4120_s1 = inlined_call_operand.vmem [shape: f32[2,16,16,8], index: 1, kind: input, shape index: {}, may-alias: {0,1,2}]   ;;  %s4121_s2 = inlined_call_operand.vmem [shape: f32[2,16,16,8], index: 2, kind: input, shape index: {}, may-alias: {0,1,2}]   ;;  %s4122_s3 = inlined_call_operand.vmem [shape: f32[8,8], index: 3, kind: input, shape index: {}]   ;;  %s4123_s4 = inlined_call_operand.vmem [shape: f32[1,8], index: 4, kind: input, shape index: {}]   ;;  %s4124_s5 = inlined_call_operand.vmem [shape: f32[72,8], index: 5, kind: input, shape index: {}]   ;;  %s4125_s6 = inlined_call_operand.vmem [shape: f32[1,8], index: 6, kind: input, shape index: {}]   ;;  %s4126_s7 = inlined_call_operand.vmem [shape: f32[8,32], index: 7, kind: input, shape index: {}]   ;;  %s4127_s8 = inlined_call_operand.vmem [shape: f32[8,32], index: 8, kind: input, shape index: {}]   ;;  %s4128_s9 = inlined_call_operand.vmem [shape: f32[1,32], index: 9, kind: input, shape index: {}]   ;;  %s4129_s10 = inlined_call_operand.hbm [shape: f32[2,16,16,32], index: 10, kind: output, shape index: {0}]   ;;  %s4130_s11 = inlined_call_operand.vmem [shape: f32[2,16,16,8], index: 11, kind: output, shape index: {1}]  }
   0x1   :  { %4145 = sst [smem:[#allocation21_spill]] %s4120_s1 }
   0x2   :  { %4146 = sst [smem:[#allocation22_spill]] %s4122_s3 }
   0x3   :  { %17 = vsyncpa [#allocation4], 0 }
   0x4   :  { %19 = vsyncpa [#allocation4 + $0x1], 0  ;;  %s3096_s17 = smov 0   ;;  %s3098_s18 = smov 0  }
   0x5   :  { %s3100_s19 = smov 0   ;;  %s3102_s20 = smov 0  }
   0x6   :  { %s3104_s21 = smov 0   ;;  %s3106_s22 = smov 0  }
   0x7   :  { %s3108_s23 = smov 0   ;;  %s3110_s24 = smov 0  }
   0x8 LB: > { %4147 = sst [smem:[#allocation6_spill]] %s3027_s23  ;;  %s2609_s25 = sadd.s32 4294967295, %s3031_s24   ;;  %s3031_s24 = sphi %s3110_s24, %s25_s24   ;;  %s3027_s23 = sphi %s3108_s23, %s4181_s23   ;;  %s3023_s22 = sphi %s3106_s22, %s4186_s22   ;;  %s3019_s21 = sphi %s3104_s21, %s4179_s21   ;;  %s3015_s20 = sphi %s3102_s20, %s4185_s20   ;;  %s3011_s19 = sphi %s3100_s19, %s4184_s19   ;;  %s3007_s18 = sphi %s3098_s18, %s4183_s18   ;;  %s3003_s17 = sphi %s3096_s17, %s4182_s17  }
   0x9   : > { %s2610_s26 = sadd.s32 4294967294, %s3031_s24   ;;  %s34_s27 = sadd.s32 1, %s3023_s22 }
   0xa   : > { %p35_p0 = scmp.ge.s32.totalorder %s34_s27, 2  ;;  %s37_s28 = sadd.s32 1, %s3027_s23 }
   0xb   : > { %p303_p1 = scmp.ne.s32.totalorder %s3011_s19, %s3007_s18  ;;  %p304_p2 = scmp.eq.s32.totalorder %s2609_s25, 3 }
   0xc   : > { %s4188_s27 = smov (%p35_p0, %s34_s27), 0  ;;  %s4190_s28 = smov (!%p35_p0, %s37_s28), %s3027_s23 }
   0xd   : > { %4148 = sst [smem:[#allocation7_spill]] %s4188_s27  ;;  %s289_s29 = ssub.s32 %s3023_s22, %s4188_s27 }
   0xe   : > { %p3147_p3 = por %p304_p2, %p303_p1  ;;  %p39_p4 = scmp.ge.s32.totalorder %s4190_s28, 2 }
   0xf   : > { %p309_p5 = scmp.ne.s32.totalorder %s3007_s18, %s3003_s17  ;;  %p310_p6 = scmp.eq.s32.totalorder %s2610_s26, 3 }
  0x10   : > { %p2619_p7 = scmp.ge.s32.totalorder %s3031_s24, 1  ;;  %s4192_s28 = smov (%p39_p4, %s4190_s28), 0 }
  0x11   : > { %4150 = sst [smem:[#allocation8_spill]] %s4192_s28  ;;  %p3156_p8 = por %p310_p6, %p309_p5 }
  0x12   : > { %p431_p9 = scmp.lt.s32.totalorder %s3031_s24, 5  ;;  %s288_s13 = ssub.s32 %s3027_s23, %s4192_s28 }
  0x13   : > { %s293_s14 = sadd.s32 1, %s3011_s19  ;;  %s290_s15 = sor.u32 %s289_s29, %s288_s13 }
  0x14   : > { %p432_p10 = pnand %p2619_p7, %p431_p9  ;;  %p291_p11 = scmp.eq.s32.totalorder %s290_s15, 0 }
  0x16   : > { %s3165_s16 = scalar_select %p291_p11, %s3011_s19, %s293_s14  }
  0x17   : > { %435 = sbr.rel (%p432_p10) target bundleno = 963 (0x3c3), region = 60 }
  0x1c   : > { %s4152_s3 = sld [smem:[#allocation22_spill]]  ;;  %s3171_s26 = sshll.u32 %s3015_s20, 3  ;;  %vm611_vm0 = vcmask 64512   ;;  %vm571_vm1 = vcmask 57344   ;;  %v3033_v15 = vmov 0.0   ;;  %v1261_v17 = vld [vmem:[%s4124_s5 + $0x18] sm:$0xff] }
  0x1d   : > { %p516_p12 = scmp.lt.s32.totalorder %s3019_s21, 1  ;;  %p532_p13 = scmp.lt.s32.totalorder %s3171_s26, 15  ;;  %573 = vst.msk [vmem:[#allocation2 + $0x18] sm:$0x1] %vm571_vm1, %v3033_v15  ;;  %v3305_v20 = vld [vmem:[%s4123_s4] ss:$0 sm:$0xff] }
  0x1e   : > { %s4153_s1 = sld [smem:[#allocation21_spill]]  ;;  %572 = vst.msk [vmem:[#allocation2] sm:$0x1] %vm571_vm1, %v3033_v15  ;;  %p758_p4 = scmp.gt.s32.totalorder %s3015_s20, 0  ;;  %vm2390_vm2 = vcmask 261120  }
  0x1f   : > { %s517_s29 = scalar_select %p516_p12, %s3019_s21, 1  ;;  %574 = vst.msk [vmem:[#allocation2 + $0x30] sm:$0x1] %vm571_vm1, %v3033_v15 }
  0x20   : > { %s533_s13 = scalar_select %p532_p13, %s3171_s26, 15  ;;  %575 = vst.msk [vmem:[#allocation2 + $0x48] sm:$0x1] %vm571_vm1, %v3033_v15 }
  0x21   : > { %s3177_s14 = sshll.u32 %s517_s29, 5  ;;  %576 = vst.msk [vmem:[#allocation2 + $0x60] sm:$0x1] %vm571_vm1, %v3033_v15  ;;  %p760_p5 = scmp.lt.s32.totalorder %s3015_s20, 1 }
  0x22   : > { %v569_v0 = vld [vmem:[%s4152_s3] sm:$0xff]  ;;  %s2632_s27 = sshll.u32 %s533_s13, 1  ;;  %s2622_s3 = sadd.s32 4294967295, %s3171_s26  ;;  %577 = vst.msk [vmem:[#allocation2 + $0x78] sm:$0x1] %vm571_vm1, %v3033_v15 }
  0x23   : > { %675 = vmatpush.msra.mxu0 %v569_v0  ;;  %2858 = vmatpush.msra.mxu1 %v569_v0  ;;  %s3180_s15 = sadd.s32 %s2632_s27, %s3177_s14  ;;  %p514_p0 = scmp.gt.s32.totalorder %s2622_s3, 0  ;;  %578 = vst.msk [vmem:[#allocation2 + $0x90] sm:$0x1] %vm571_vm1, %v3033_v15 }
  0x24   : > { %821 = vmatpush.msra.mxu2 %v569_v0  ;;  %2859 = vmatpush.msra.mxu3 %v569_v0  ;;  %s4134_s25 = sshll.u32 %s3180_s15, 3  ;;  %p2623_p1 = scmp.lt.s32.totalorder %s2622_s3, 15  ;;  %579 = vst.msk [vmem:[#allocation2 + $0xa8] sm:$0x1] %vm571_vm1, %v3033_v15 }
  0x25   : > { %785 = vmatpush.msrb.mxu0 %v569_v0  ;;  %s3188_s23 = scalar_lea.vmem %s4153_s1, %s4134_s25  ;;  %s4194_s3 = smov (!%p514_p0, %s2622_s3), 0  ;;  %580 = vst.msk [vmem:[#allocation2 + $0xc0] sm:$0x1] %vm571_vm1, %v3033_v15 }
  0x26   : > { %v3191_v1 = vld [vmem:[%s3188_s23] sm:$0xff]  ;;  %v3196_v2 = vld [vmem:[%s3188_s23 + $0x8] sm:$0xff]  ;;  %v3201_v3 = vld [vmem:[%s3188_s23 + $0x10] sm:$0xff]  ;;  %s4196_s3 = smov (!%p2623_p1, %s4194_s3), 15  ;;  %581 = vst.msk [vmem:[#allocation2 + $0xd8] sm:$0x1] %vm571_vm1, %v3033_v15 }
  0x27   : > { %2646 = vmatmul.msk.f32.vlgmr.msra.gmra.mxu0 %vm611_vm0, %v3191_v1  ;;  %v3206_v4 = vld [vmem:[%s3188_s23 + $0x18] sm:$0xff]  ;;  %v3211_v5 = vld [vmem:[%s3188_s23 + $0x20] sm:$0xff]  ;;  %v3216_v6 = vld [vmem:[%s3188_s23 + $0x28] sm:$0xff]  ;;  %s2628_s28 = sshll.u32 %s4196_s3, 1  ;;  %582 = vst.msk [vmem:[#allocation2 + $0x11] sm:$0x1] %vm571_vm1, %v3033_v15 }
  0x28   : > { %v3221_v7 = vld [vmem:[%s3188_s23 + $0x30] sm:$0xff]  ;;  %v3226_v8 = vld [vmem:[%s3188_s23 + $0x38] sm:$0xff]  ;;  %v3231_v9 = vld [vmem:[%s3188_s23 + $0x40] sm:$0xff]  ;;  %s522_s29 = sadd.s32 %s3177_s14, %s2628_s28  ;;  %1325 = vmatpush.msra.mxu0 %v1261_v17  ;;  %583 = vst.msk [vmem:[#allocation2 + $0x29] sm:$0x1] %vm571_vm1, %v3033_v15 }
  0x29   : > { %4154 = vst [vmem:[#allocation9_spill] sm:$0xff] %v3221_v7  ;;  %v3237_v10 = vld [vmem:[%s3188_s23 + $0x48] sm:$0xff]  ;;  %v3242_v11 = vld [vmem:[%s3188_s23 + $0x50] sm:$0xff]  ;;  %v3247_v12 = vld [vmem:[%s3188_s23 + $0x58] sm:$0xff]  ;;  %s2630_s13 = sshll.u32 %s522_s29, 3  ;;  %s2857_s29 = sshll.u32 %s3015_s20, 4 }
  0x2a   : > { %4155 = vst [vmem:[#allocation10_spill] sm:$0xff] %v3226_v8  ;;  %s3255_s1 = scalar_lea.vmem %s4119_s0, %s2630_s13  ;;  %v3258_v13 = vld [vmem:[%s3188_s23 + $0x60] sm:$0xff]  ;;  %v3268_v16 = vld [vmem:[%s3188_s23 + $0x68] sm:$0xff]  ;;  %v3284_v18 = vld [vmem:[%s3188_s23 + $0x70] sm:$0xff] }
  0x2b   : > { %4156 = vst [vmem:[#allocation11_spill] sm:$0xff] %v3231_v9  ;;  %v763_v14 = vld [vmem:[%s3255_s1 + $0x8] sm:$0xff]  ;;  %v3297_v19 = vld [vmem:[%s3188_s23 + $0x78] sm:$0xff]  ;;  %v762_v22 = vld [vmem:[%s3255_s1] sm:$0xff]  ;;  %s2856_s1 = sadd.s32 8, %s3171_s26 }
  0x2c   : > { %4157 = vst [vmem:[#allocation12_spill] sm:$0xff] %v3237_v10  ;;  %2663 = vmatmul.msk.f32.vlgmr.msra.gmra.mxu1 %vm611_vm0, %v763_v14  ;;  %p542_p2 = scmp.lt.s32.totalorder %s2856_s1, 15 }
  0x2d   : > { %4158 = vst [vmem:[#allocation13_spill] sm:$0xff] %v3242_v11  ;;  %s761_s28 = scalar_select %p760_p5, 1.0, 0.0 }
  0x2e   : > { %4159 = vst [vmem:[#allocation14_spill] sm:$0xff] %v3247_v12  ;;  %s4198_s1 = smov (!%p542_p2, %s2856_s1), 15 }
  0x2f   : > { %2647 = vmatmul.msk.f32.gmra.mxu0 %vm611_vm0, %v3196_v2  ;;  %4160 = vst [vmem:[#allocation15_spill] sm:$0xff] %v3258_v13  ;;  %s4200_s1 = smov (!%p542_p2, %s4198_s1), 15 }
  0x30   : > { %4161 = vst [vmem:[#allocation16_spill] sm:$0xff] %v3268_v16  ;;  %s2639_s23 = sshll.u32 %s4200_s1, 1  ;;  %s2845_s1 = sshll.u32 %s3019_s21, 5 }
  0x31   : > { %4162 = vst [vmem:[#allocation17_spill] sm:$0xff] %v3284_v18  ;;  %s550_s26 = sadd.s32 %s2639_s23, %s3177_s14  ;;  %s4178_s23 = sshll.u32 %s3180_s15, 3 }
  0x32   : > { %584 = vst.msk [vmem:[#allocation2 + $0x41] sm:$0x1] %vm571_vm1, %v3033_v15  ;;  %s2641_s13 = sshll.u32 %s550_s26, 3  ;;  %s3930_s27 = scalar_lea.vmem %s4130_s11, %s4178_s23 }
  0x33   : > { %585 = vst.msk [vmem:[#allocation2 + $0x59] sm:$0x1] %vm571_vm1, %v3033_v15  ;;  %s552_s3 = scalar_lea.vmem %s4121_s2, %s2641_s13  ;;  %s497_s15 = sand.u32 1, %s3007_s18  }
  0x34   : > { %586 = vst.msk [vmem:[#allocation2 + $0x71] sm:$0x1] %vm571_vm1, %v3033_v15  ;;  %s3384_s14 = scalar_select %p758_p4, 1.0, 0.0 }
  0x35   : > { %587 = vst.msk [vmem:[#allocation2 + $0x89] sm:$0x1] %vm571_vm1, %v3033_v15  ;;  %s2430_s23 = sadd.s32 %s2857_s29, %s2845_s1 }
  0x36   : > { %588 = vst.msk [vmem:[#allocation2 + $0xa1] sm:$0x1] %vm571_vm1, %v3033_v15  ;;  %s2846_s26 = sshll.u32 %s2430_s23, 3 }
  0x37   : > { %2648 = vmatmul.msk.f32.gmra.mxu0 %vm611_vm0, %v3201_v3  ;;  %589 = vst.msk [vmem:[#allocation2 + $0xb9] sm:$0x1] %vm571_vm1, %v3033_v15  ;;  %s2432_s25 = scalar_lea.hbm %s4129_s10, %s2846_s26  ;;  %s2957_s26 = scalar_lea.hbm %s4129_s10, 512 }
  0x38   : > { %590 = vst.msk [vmem:[#allocation2 + $0xd1] sm:$0x1] %vm571_vm1, %v3033_v15  ;;  %s2435_s21 = sshll.u32 %s2432_s25, 4  ;;  %s2436_s21 = int_to_ptr.hbm [resolvable:$true] %s2435_s21 }
  0x39   : > { %4163 = vst [vmem:[#allocation18_spill] sm:$0xff] %v3297_v19 }
  0x3a   : > { %591 = vst.msk [vmem:[#allocation2 + $0xe9] sm:$0x1] %vm571_vm1, %v3033_v15 }
  0x3f   : > { %2649 = vmatmul.msk.f32.gmra.mxu0 %vm611_vm0, %v3206_v4 }
  0x47   : > { %2650 = vmatmul.msk.f32.gmra.mxu0 %vm611_vm0, %v3211_v5 }
  0x4f   : > { %2651 = vmatmul.msk.f32.gmra.mxu0 %vm611_vm0, %v3216_v6 }
  0x57   : > { %2652 = vmatmul.msk.f32.gmra.mxu0 %vm611_vm0, %v3221_v7 }
  0x5f   : > { %2653 = vmatmul.msk.f32.gmra.mxu0 %vm611_vm0, %v3226_v8 }
  0x67   : > { %2654 = vmatmul.msk.f32.gmra.mxu0 %vm611_vm0, %v3231_v9 }
  0x6f   : > { %2655 = vmatmul.msk.f32.gmra.mxu0 %vm611_vm0, %v3237_v10 }
  0x77   : > { %2656 = vmatmul.msk.f32.gmra.mxu0 %vm611_vm0, %v3242_v11 }
  0x7f   : > { %2657 = vmatmul.msk.f32.gmra.mxu0 %vm611_vm0, %v3247_v12 }
  0x87   : > { %2658 = vmatmul.msk.f32.gmra.mxu0 %vm611_vm0, %v3258_v13 }
  0x8f   : > { %2659 = vmatmul.msk.f32.gmra.mxu0 %vm611_vm0, %v3268_v16  ;;  %v1553_v16 = vld [vmem:[%s4124_s5 + $0x28] sm:$0xff] }
  0x97   : > { %2660 = vmatmul.msk.f32.gmra.mxu0 %vm611_vm0, %v3284_v18 }
  0x9f   : > { %2661 = vmatmul.msk.f32.gmra.mxu0 %vm611_vm0, %v3297_v19 }
  0xa4   : > { %v677_v21 = vpop.f32.mrf.mxu0 }
  0xa5   : > { %v678_v23 = vadd.f32 %v3305_v20, %v677_v21 }
  0xa7   : > { %v725_v24 = vmax.f32 %v678_v23, 0.0  ;;  %2662 = vmatmul.msk.f32.vlgmr.msrb.gmra.mxu0 %vm611_vm0, %v762_v22  ;;  %v798_v22 = vld [vmem:[%s552_s3] sm:$0xff] }
  0xa8   : > { %2664 = vmatmul.msk.f32.vlgmr.msra.gmra.mxu2 %vm611_vm0, %v798_v22 }
  0xa9   : > { %742 = vst.msk [vmem:[#allocation2 + $0x19] sm:$0xff] %vm611_vm0, %v725_v24  ;;  %v790_v24 = vpop.f32.mrf.mxu1 }
  0xac   : > { %v680_v25 = vpop.f32.mrf.mxu0 }
  0xad   : > { %v681_v26 = vadd.f32 %v3305_v20, %v680_v25 }
  0xaf   : > { %v726_v27 = vmax.f32 %v681_v26, 0.0  ;;  %v791_v26 = vadd.f32 %v3305_v20, %v790_v24 }
  0xb0   : > { %v3312_v28 = vld [vmem:[#allocation2 + $0x18] sm:$0xff] }
  0xb1   : > { %743 = vst.msk [vmem:[#allocation2 + $0x21] sm:$0xff] %vm611_vm0, %v726_v27  ;;  %2714 = vmatmul.msk.f32.vlgmr.msra.gmra.mxu0 %vm611_vm0, %v3312_v28 }
  0xb4   : > { %v683_v29 = vpop.f32.mrf.mxu0 }
  0xb5   : > { %v684_v30 = vadd.f32 %v3305_v20, %v683_v29  ;;  %v795_v29 = vstv %s3384_s14  ;;  %s2620_s14 = sshll.u32 %s497_s15, 7 }
  0xb7   : > { %v727_v31 = vmax.f32 %v684_v30, 0.0  ;;  %v794_v30 = vmax.f32 %v791_v26, 0.0 }
  0xb8   : > { %v3318_v32 = vld [vmem:[#allocation2 + $0x20] sm:$0xff] }
  0xb9   : > { %744 = vst.msk [vmem:[#allocation2 + $0x31] sm:$0xff] %vm611_vm0, %v727_v31  ;;  %2715 = vmatmul.msk.f32.gmra.mxu0 %vm611_vm0, %v3318_v32 }
  0xbc   : > { %v686_v33 = vpop.f32.mrf.mxu0 }
  0xbd   : > { %v687_v34 = vadd.f32 %v3305_v20, %v686_v33  ;;  %v797_v33 = vmul.f32 %v795_v29, %v794_v30  ;;  %v3459_v30 = vld [vmem:[#allocation2 + $0x1a] sm:$0xff] }
  0xbf   : > { %v728_v35 = vmax.f32 %v687_v34, 0.0  ;;  %v799_v34 = vld [vmem:[%s552_s3 + $0x8] sm:$0xff]  ;;  %835 = vst.msk [vmem:[#allocation2 + $0x9] sm:$0xff] %vm611_vm0, %v797_v33  ;;  %s2408_s3 = scalar_lea.sflag [#allocation4], %s497_s15 }
  0xc0   : > { %v3324_v36 = vld [vmem:[#allocation2 + $0x30] sm:$0xff]  ;;  %2665 = vmatmul.msk.f32.vlgmr.msra.gmra.mxu3 %vm611_vm0, %v799_v34  ;;  %v3467_v34 = vld [vmem:[#allocation2 + $0x21] sm:$0xff] }
  0xc1   : > { %745 = vst.msk [vmem:[#allocation2 + $0x39] sm:$0xff] %vm611_vm0, %v728_v35  ;;  %2716 = vmatmul.msk.f32.gmra.mxu0 %vm611_vm0, %v3324_v36  ;;  %v872_v35 = vld [vmem:[%s4124_s5 + $0x8] sm:$0xff] }
  0xc2   : > { %936 = vmatpush.msrb.mxu3 %v872_v35  ;;  %v3473_v35 = vld [vmem:[#allocation2 + $0x22] sm:$0xff] }
  0xc4   : > { %v689_v37 = vpop.f32.mrf.mxu0 }
  0xc5   : > { %v690_v38 = vadd.f32 %v3305_v20, %v689_v37 }
  0xc6   : > { %v857_v24 = vld [vmem:[#allocation2 + $0x9] sm:$0xff] }
  0xc7   : > { %v729_v39 = vmax.f32 %v690_v38, 0.0 }
  0xc8   : > { %v3330_v40 = vld [vmem:[#allocation2 + $0x38] sm:$0xff] }
  0xc9   : > { %746 = vst.msk [vmem:[#allocation2 + $0x49] sm:$0xff] %vm611_vm0, %v729_v39  ;;  %2717 = vmatmul.msk.f32.gmra.mxu0 %vm611_vm0, %v3330_v40  ;;  %v1846_v39 = vld [vmem:[%s4124_s5 + $0x38] sm:$0xff] }
  0xca   : > { %1910 = vmatpush.msrb.mxu0 %v1846_v39 }
  0xcc   : > { %v692_v41 = vpop.f32.mrf.mxu0 }
  0xcd   : > { %v693_v42 = vadd.f32 %v3305_v20, %v692_v41 }
  0xcf   : > { %v730_v43 = vmax.f32 %v693_v42, 0.0 }
  0xd0   : > { %v3336_v44 = vld [vmem:[#allocation2 + $0x48] sm:$0xff] }
  0xd1   : > { %747 = vst.msk [vmem:[#allocation2 + $0x51] sm:$0xff] %vm611_vm0, %v730_v43  ;;  %2718 = vmatmul.msk.f32.gmra.mxu0 %vm611_vm0, %v3336_v44  ;;  %v855_v43 = vld [vmem:[%s4124_s5] sm:$0xff] }
  0xd2   : > { %1049 = vmatpush.msrb.mxu1 %v855_v43 }
  0xd4   : > { %v695_v45 = vpop.f32.mrf.mxu0  ;;  %1617 = vmatpush.msra.mxu1 %v1553_v16 }
  0xd5   : > { %v696_v46 = vadd.f32 %v3305_v20, %v695_v45  ;;  %v1115_v45 = vld [vmem:[%s4124_s5 + $0x10] sm:$0xff] }
  0xd6   : > { %1179 = vmatpush.msrb.mxu2 %v1115_v45 }
  0xd7   : > { %v731_v47 = vmax.f32 %v696_v46, 0.0 }
  0xd8   : > { %v3342_v48 = vld [vmem:[#allocation2 + $0x50] sm:$0xff] }
  0xd9   : > { %748 = vst.msk [vmem:[#allocation2 + $0x61] sm:$0xff] %vm611_vm0, %v731_v47  ;;  %2719 = vmatmul.msk.f32.gmra.mxu0 %vm611_vm0, %v3342_v48  ;;  %v1407_v47 = vld [vmem:[%s4124_s5 + $0x20] sm:$0xff]  ;;  %v3463_v33 = vld [vmem:[#allocation2 + $0x51] sm:$0xff] }
  0xda   : > { %1471 = vmatpush.msra.mxu3 %v1407_v47  ;;  %v3511_v43 = vld [vmem:[#allocation2 + $0x4a] sm:$0xff] }
  0xdc   : > { %v698_v49 = vpop.f32.mrf.mxu0 }
  0xdd   : > { %v699_v50 = vadd.f32 %v3305_v20, %v698_v49 }
  0xdf   : > { %v732_v51 = vmax.f32 %v699_v50, 0.0 }
  0xe0   : > { %v3348_v52 = vld [vmem:[#allocation2 + $0x60] sm:$0xff] }
  0xe1   : > { %749 = vst.msk [vmem:[#allocation2 + $0x69] sm:$0xff] %vm611_vm0, %v732_v51  ;;  %2720 = vmatmul.msk.f32.gmra.mxu0 %vm611_vm0, %v3348_v52 }
  0xe4   : > { %v701_v53 = vpop.f32.mrf.mxu0 }
  0xe5   : > { %v702_v54 = vadd.f32 %v3305_v20, %v701_v53 }
  0xe7   : > { %v733_v55 = vmax.f32 %v702_v54, 0.0 }
  0xe8   : > { %v3355_v56 = vld [vmem:[#allocation2 + $0x68] sm:$0xff] }
  0xe9   : > { %750 = vst.msk [vmem:[#allocation2 + $0x79] sm:$0xff] %vm611_vm0, %v733_v55  ;;  %2721 = vmatmul.msk.f32.gmra.mxu0 %vm611_vm0, %v3355_v56 }
  0xec   : > { %v704_v57 = vpop.f32.mrf.mxu0 }
  0xed   : > { %v705_v58 = vadd.f32 %v3305_v20, %v704_v57 }
  0xef   : > { %v734_v59 = vmax.f32 %v705_v58, 0.0 }
  0xf0   : > { %v3361_v60 = vld [vmem:[#allocation2 + $0x78] sm:$0xff] }
  0xf1   : > { %751 = vst.msk [vmem:[#allocation2 + $0x81] sm:$0xff] %vm611_vm0, %v734_v59  ;;  %2722 = vmatmul.msk.f32.gmra.mxu0 %vm611_vm0, %v3361_v60  ;;  %v3501_v39 = vld [vmem:[#allocation2 + $0x79] sm:$0xff] }
  0xf4   : > { %v707_v61 = vpop.f32.mrf.mxu0 }
  0xf5   : > { %v708_v62 = vadd.f32 %v3305_v20, %v707_v61 }
  0xf7   : > { %v735_v63 = vmax.f32 %v708_v62, 0.0 }
  0xf8   : > { %v3367_v0 = vld [vmem:[#allocation2 + $0x80] sm:$0xff] }
  0xf9   : > { %752 = vst.msk [vmem:[#allocation2 + $0x91] sm:$0xff] %vm611_vm0, %v735_v63  ;;  %2723 = vmatmul.msk.f32.gmra.mxu0 %vm611_vm0, %v3367_v0  ;;  %v3515_v45 = vld [vmem:[#allocation2 + $0x81] sm:$0xff] }
  0xfa   : > { %v3581_v19 = vld [vmem:[#allocation2 + $0x82] sm:$0xff] }
  0xfc   : > { %v710_v14 = vpop.f32.mrf.mxu0 }
  0xfd   : > { %v711_v15 = vadd.f32 %v3305_v20, %v710_v14  ;;  %v3435_v14 = vld [vmem:[#allocation2 + $0x31] sm:$0xff] }
  0xff   : > { %v736_v17 = vmax.f32 %v711_v15, 0.0 }
 0x100   : > { %v3378_v21 = vld [vmem:[#allocation2 + $0x90] sm:$0xff] }
 0x101   : > { %753 = vst.msk [vmem:[#allocation2 + $0x99] sm:$0xff] %vm611_vm0, %v736_v17  ;;  %2724 = vmatmul.msk.f32.gmra.mxu0 %vm611_vm0, %v3378_v21 }
 0x104   : > { %v713_v23 = vpop.f32.mrf.mxu0 }
 0x105   : > { %v714_v25 = vadd.f32 %v3305_v20, %v713_v23  ;;  %v3442_v23 = vld [vmem:[#allocation2 + $0x39] sm:$0xff] }
 0x107   : > { %v737_v27 = vmax.f32 %v714_v25, 0.0  ;;  %v1100_v25 = vld [vmem:[#allocation2 + $0xa] sm:$0xff] }
 0x108   : > { %v3389_v31 = vld [vmem:[#allocation2 + $0x98] sm:$0xff] }
 0x109   : > { %754 = vst.msk [vmem:[#allocation2 + $0xa9] sm:$0xff] %vm611_vm0, %v737_v27  ;;  %2725 = vmatmul.msk.f32.gmra.mxu0 %vm611_vm0, %v3389_v31  ;;  %v3449_v27 = vld [vmem:[#allocation2 + $0x49] sm:$0xff] }
 0x10c   : > { %v716_v37 = vpop.f32.mrf.mxu0 }
 0x10d   : > { %v717_v38 = vadd.f32 %v3305_v20, %v716_v37  ;;  %v3485_v37 = vld [vmem:[#allocation2 + $0x32] sm:$0xff] }
 0x10f   : > { %v738_v41 = vmax.f32 %v717_v38, 0.0  ;;  %v3497_v38 = vld [vmem:[#allocation2 + $0x3a] sm:$0xff] }
 0x110   : > { %v3403_v42 = vld [vmem:[#allocation2 + $0xa8] sm:$0xff] }
 0x111   : > { %755 = vst.msk [vmem:[#allocation2 + $0xb1] sm:$0xff] %vm611_vm0, %v738_v41  ;;  %2726 = vmatmul.msk.f32.gmra.mxu0 %vm611_vm0, %v3403_v42 }
 0x114   : > { %v719_v46 = vpop.f32.mrf.mxu0 }
 0x115   : > { %v720_v49 = vadd.f32 %v3305_v20, %v719_v46  ;;  %v3523_v46 = vld [vmem:[#allocation2 + $0x52] sm:$0xff] }
 0x117   : > { %v739_v50 = vmax.f32 %v720_v49, 0.0  ;;  %v3529_v49 = vld [vmem:[#allocation2 + $0x91] sm:$0xff] }
 0x118   : > { %v3418_v51 = vld [vmem:[#allocation2 + $0xb0] sm:$0xff] }
 0x119   : > { %756 = vst.msk [vmem:[#allocation2 + $0xc1] sm:$0xff] %vm611_vm0, %v739_v50  ;;  %2727 = vmatmul.msk.f32.gmra.mxu0 %vm611_vm0, %v3418_v51  ;;  %v3537_v50 = vld [vmem:[#allocation2 + $0x62] sm:$0xff] }
 0x11c   : > { %v722_v53 = vpop.f32.mrf.mxu0 }
 0x11d   : > { %v723_v54 = vadd.f32 %v3305_v20, %v722_v53 }
 0x11f   : > { %v740_v55 = vmax.f32 %v723_v54, 0.0  ;;  %v3543_v54 = vld [vmem:[#allocation2 + $0x99] sm:$0xff] }
 0x120   : > { %v3424_v57 = vld [vmem:[#allocation2 + $0xc0] sm:$0xff] }
 0x121   : > { %757 = vst.msk [vmem:[#allocation2 + $0xc9] sm:$0xff] %vm611_vm0, %v740_v55  ;;  %2728 = vmatmul.msk.f32.gmra.mxu0 %vm611_vm0, %v3424_v57  ;;  %v3551_v55 = vld [vmem:[#allocation2 + $0x6a] sm:$0xff]  ;;  %v3590_v18 = vld [vmem:[#allocation2 + $0xc1] sm:$0xff] }
 0x124   : > { %v787_v58 = vpop.f32.mrf.mxu0 }
 0x125   : > { %v788_v59 = vadd.f32 %v3305_v20, %v787_v58  ;;  %v3556_v58 = vld [vmem:[#allocation2 + $0xa9] sm:$0xff] }
 0x127   : > { %v793_v61 = vmax.f32 %v788_v59, 0.0 }
 0x128   : > { %v3430_v62 = vld [vmem:[#allocation2 + $0xc8] sm:$0xff] }
 0x129   : > { %v796_v63 = vmul.f32 %v795_v29, %v793_v61  ;;  %2729 = vmatmul.msk.f32.gmra.mxu0 %vm611_vm0, %v3430_v62  ;;  %v3453_v29 = vld [vmem:[#allocation2 + $0x19] sm:$0xff]  ;;  %v3611_v16 = vld [vmem:[#allocation2 + $0xc9] sm:$0xff] }
 0x12a   : > { %v3566_v61 = vld [vmem:[#allocation2 + $0x7a] sm:$0xff] }
 0x12b   : > { %834 = vst.msk [vmem:[#allocation2 + $0x1] sm:$0xff] %vm611_vm0, %v796_v63  ;;  %v823_v63 = vpop.f32.mrf.mxu2 }
 0x12e   : > { %v3505_v41 = vpop.f32.mrf.mxu0 }
 0x131   : > { %2778 = vmatmul.msk.f32.vlgmr.msrb.gmra.mxu0 %vm611_vm0, %v3435_v14 }
 0x132   : > { %v856_v15 = vld [vmem:[#allocation2 + $0x1] sm:$0xff] }
 0x133   : > { %v839_v17 = vld [vmem:[#allocation2] sm:$0xff]  ;;  %2666 = vmatmul.msk.f32.vlgmr.msrb.gmra.mxu3 %vm611_vm0, %v856_v15  ;;  %v840_v26 = vld [vmem:[#allocation2 + $0x8] sm:$0xff]  ;;  %v824_v15 = vadd.f32 %v3305_v20, %v823_v63 }
 0x134   : > { %v1099_v22 = vld [vmem:[#allocation2 + $0x2] sm:$0xff]  ;;  %2682 = vmatmul.msk.f32.vlgmr.msrb.gmra.mxu1 %vm611_vm0, %v839_v17  ;;  %v831_v17 = vstv %s761_s28  ;;  %s4024_s28 = scalar_lea.vmem [#allocation3], %s2620_s14  ;;  %s2951_s14 = sshra.s32 %s2436_s21, 4  ;;  %s2952_s14 = int_to_ptr.hbm [resolvable:$true] %s2951_s14 }
 0x135   : > { %2698 = vmatmul.msk.f32.vlgmr.msrb.gmra.mxu2 %vm611_vm0, %v1099_v22  ;;  %v3571_v22 = vld [vmem:[#allocation2 + $0xb1] sm:$0xff]  ;;  %s2433_s20 = sshll.u32 %s4024_s28, 4  ;;  %s2953_s29 = scalar_lea.hbm %s2952_s14, 128  ;;  %s2434_s20 = int_to_ptr.vmem [resolvable:$true] %s2433_s20 }
 0x136   : > { %v3527_v47 = vpop.f32.mrf.mxu0  ;;  %p2954_p6 = scmp.ne.s32.totalorder %s2952_s14, %s2953_s29  ;;  %p2958_p10 = scmp.lt.s32.totalorder %s2952_s14, %s4129_s10 }
 0x137   : > { %p2959_p11 = scmp.lt.s32.totalorder %s2957_s26, %s2953_s29 }
 0x138   : > { %p2955_p7 = pnand %p2954_p6, %p3147_p3 }
 0x139   : > { %2779 = vmatmul.msk.f32.gmra.mxu0 %vm611_vm0, %v3442_v23  ;;  %p2960_p12 = por %p2959_p11, %p2958_p10 }
 0x13a   : > { %p2956_p9 = pneg %p2955_p7 }
 0x13b   : > { %2667 = vmatmul.msk.f32.gmra.mxu3 %vm611_vm0, %v857_v24  ;;  %v829_v24 = vmax.f32 %v824_v15, 0.0  ;;  %v1700_v15 = vld [vmem:[%s4124_s5 + $0x30] sm:$0xff] }
 0x13c   : > { %2683 = vmatmul.msk.f32.gmra.mxu1 %vm611_vm0, %v840_v26  ;;  %1764 = vmatpush.msra.mxu2 %v1700_v15  ;;  %p2961_p13 = pnand %p2960_p12, %p2956_p9 }
 0x13d   : > { %2699 = vmatmul.msk.f32.gmra.mxu2 %vm611_vm0, %v1100_v25  ;;  %v832_v25 = vmul.f32 %v831_v17, %v829_v24 }
 0x13e   : > { %v3541_v53 = vpop.f32.mrf.mxu0 }
 0x13f   : > { %837 = vst.msk [vmem:[#allocation2 + $0xd9] sm:$0xff] %vm611_vm0, %v832_v25  ;;  %v3601_v25 = vld [vmem:[#allocation2 + $0x92] sm:$0xff] }
 0x141   : > { %2780 = vmatmul.msk.f32.gmra.mxu0 %vm611_vm0, %v3449_v27 }
 0x143   : > { %2668 = vmatmul.msk.f32.gmra.mxu3 %vm611_vm0, %v3453_v29  ;;  %v826_v63 = vpop.f32.mrf.mxu3 }
 0x144   : > { %2684 = vmatmul.msk.f32.gmra.mxu1 %vm611_vm0, %v3312_v28  ;;  %v3477_v28 = vld [vmem:[#allocation2 + $0x61] sm:$0xff]  ;;  %v827_v24 = vadd.f32 %v3305_v20, %v826_v63 }
 0x145   : > { %2700 = vmatmul.msk.f32.gmra.mxu2 %vm611_vm0, %v3459_v30  ;;  %v1992_v63 = vld [vmem:[%s4124_s5 + $0x40] sm:$0xff] }
 0x146   : > { %v3558_v59 = vpop.f32.mrf.mxu0  ;;  %v830_v13 = vmax.f32 %v827_v24, 0.0  ;;  %2056 = vmatpush.msrb.mxu3 %v1992_v63 }
 0x148   : > { %v833_v20 = vmul.f32 %v831_v17, %v830_v13  ;;  %v3619_v13 = vld [vmem:[#allocation2 + $0x9a] sm:$0xff] }
 0x149   : > { %2781 = vmatmul.msk.f32.gmra.mxu0 %vm611_vm0, %v3463_v33  ;;  %v1844_v17 = vld [vmem:[#allocation2 + $0xd9] sm:$0xff] }
 0x14a   : > { %838 = vst.msk [vmem:[#allocation2 + $0xe1] sm:$0xff] %vm611_vm0, %v833_v20  ;;  %v3630_v20 = vld [vmem:[#allocation2 + $0xaa] sm:$0xff] }
 0x14b   : > { %2669 = vmatmul.msk.f32.gmra.mxu3 %vm611_vm0, %v3467_v34 }
 0x14c   : > { %2685 = vmatmul.msk.f32.gmra.mxu1 %vm611_vm0, %v3318_v32  ;;  %v3489_v32 = vld [vmem:[#allocation2 + $0x69] sm:$0xff] }
 0x14d   : > { %2701 = vmatmul.msk.f32.gmra.mxu2 %vm611_vm0, %v3473_v35 }
 0x14e   : > { %v3575_v26 = vpop.f32.mrf.mxu0 }
 0x151   : > { %2782 = vmatmul.msk.f32.gmra.mxu0 %vm611_vm0, %v3477_v28  ;;  %v1845_v63 = vld [vmem:[#allocation2 + $0xe1] sm:$0xff] }
 0x153   : > { %2670 = vmatmul.msk.f32.gmra.mxu3 %vm611_vm0, %v3435_v14 }
 0x154   : > { %2686 = vmatmul.msk.f32.gmra.mxu1 %vm611_vm0, %v3324_v36 }
 0x155   : > { %2702 = vmatmul.msk.f32.gmra.mxu2 %vm611_vm0, %v3485_v37 }
 0x156   : > { %v3608_v15 = vpop.f32.mrf.mxu0 }
 0x159   : > { %2783 = vmatmul.msk.f32.gmra.mxu0 %vm611_vm0, %v3489_v32 }
 0x15b   : > { %2671 = vmatmul.msk.f32.gmra.mxu3 %vm611_vm0, %v3442_v23 }
 0x15c   : > { %2687 = vmatmul.msk.f32.gmra.mxu1 %vm611_vm0, %v3330_v40 }
 0x15d   : > { %2703 = vmatmul.msk.f32.gmra.mxu2 %vm611_vm0, %v3497_v38 }
 0x15e   : > { %v3623_v24 = vpop.f32.mrf.mxu0 }
 0x15f   : > { %4164 = vst [vmem:[#allocation19_spill] sm:$0xff] %v3623_v24 }
 0x161   : > { %2784 = vmatmul.msk.f32.gmra.mxu0 %vm611_vm0, %v3501_v39 }
 0x163   : > { %2672 = vmatmul.msk.f32.gmra.mxu3 %vm611_vm0, %v3449_v27 }
 0x164   : > { %2688 = vmatmul.msk.f32.gmra.mxu1 %vm611_vm0, %v3336_v44 }
 0x165   : > { %2704 = vmatmul.msk.f32.gmra.mxu2 %vm611_vm0, %v3511_v43 }
 0x166   : > { %v3634_v12 = vpop.f32.mrf.mxu0 }
 0x167   : > { %4165 = vst [vmem:[#allocation20_spill] sm:$0xff] %v3634_v12 }
 0x169   : > { %2785 = vmatmul.msk.f32.gmra.mxu0 %vm611_vm0, %v3515_v45 }
 0x16b   : > { %2673 = vmatmul.msk.f32.gmra.mxu3 %vm611_vm0, %v3463_v33 }
 0x16c   : > { %2689 = vmatmul.msk.f32.gmra.mxu1 %vm611_vm0, %v3342_v48 }
 0x16d   : > { %2705 = vmatmul.msk.f32.gmra.mxu2 %vm611_vm0, %v3523_v46 }
 0x171   : > { %2786 = vmatmul.msk.f32.gmra.mxu0 %vm611_vm0, %v3529_v49 }
 0x173   : > { %2674 = vmatmul.msk.f32.gmra.mxu3 %vm611_vm0, %v3477_v28 }
 0x174   : > { %2690 = vmatmul.msk.f32.gmra.mxu1 %vm611_vm0, %v3348_v52 }
 0x175   : > { %2706 = vmatmul.msk.f32.gmra.mxu2 %vm611_vm0, %v3537_v50 }
 0x179   : > { %2787 = vmatmul.msk.f32.gmra.mxu0 %vm611_vm0, %v3543_v54 }
 0x17b   : > { %2675 = vmatmul.msk.f32.gmra.mxu3 %vm611_vm0, %v3489_v32 }
 0x17c   : > { %2691 = vmatmul.msk.f32.gmra.mxu1 %vm611_vm0, %v3355_v56 }
 0x17d   : > { %2707 = vmatmul.msk.f32.gmra.mxu2 %vm611_vm0, %v3551_v55 }
 0x181   : > { %2788 = vmatmul.msk.f32.gmra.mxu0 %vm611_vm0, %v3556_v58 }
 0x183   : > { %2676 = vmatmul.msk.f32.gmra.mxu3 %vm611_vm0, %v3501_v39 }
 0x184   : > { %2692 = vmatmul.msk.f32.gmra.mxu1 %vm611_vm0, %v3361_v60 }
 0x185   : > { %2708 = vmatmul.msk.f32.gmra.mxu2 %vm611_vm0, %v3566_v61 }
 0x189   : > { %2789 = vmatmul.msk.f32.gmra.mxu0 %vm611_vm0, %v3571_v22 }
 0x18b   : > { %2677 = vmatmul.msk.f32.gmra.mxu3 %vm611_vm0, %v3515_v45 }
 0x18c   : > { %2693 = vmatmul.msk.f32.gmra.mxu1 %vm611_vm0, %v3367_v0 }
 0x18d   : > { %2709 = vmatmul.msk.f32.gmra.mxu2 %vm611_vm0, %v3581_v19 }
 0x191   : > { %2790 = vmatmul.msk.f32.gmra.mxu0 %vm611_vm0, %v3590_v18 }
 0x193   : > { %2678 = vmatmul.msk.f32.gmra.mxu3 %vm611_vm0, %v3529_v49 }
 0x194   : > { %2694 = vmatmul.msk.f32.gmra.mxu1 %vm611_vm0, %v3378_v21 }
 0x195   : > { %2710 = vmatmul.msk.f32.gmra.mxu2 %vm611_vm0, %v3601_v25 }
 0x199   : > { %2791 = vmatmul.msk.f32.gmra.mxu0 %vm611_vm0, %v3611_v16 }
 0x19b   : > { %2679 = vmatmul.msk.f32.gmra.mxu3 %vm611_vm0, %v3543_v54 }
 0x19c   : > { %2695 = vmatmul.msk.f32.gmra.mxu1 %vm611_vm0, %v3389_v31 }
 0x19d   : > { %2711 = vmatmul.msk.f32.gmra.mxu2 %vm611_vm0, %v3619_v13 }
 0x1a1   : > { %2792 = vmatmul.msk.f32.gmra.mxu0 %vm611_vm0, %v1844_v17  ;;  %v3641_v17 = vld [vmem:[#allocation2 + $0xb2] sm:$0xff] }
 0x1a3   : > { %2680 = vmatmul.msk.f32.gmra.mxu3 %vm611_vm0, %v3556_v58 }
 0x1a4   : > { %2696 = vmatmul.msk.f32.gmra.mxu1 %vm611_vm0, %v3403_v42 }
 0x1a5   : > { %2712 = vmatmul.msk.f32.gmra.mxu2 %vm611_vm0, %v3630_v20 }
 0x1a9   : > { %2793 = vmatmul.msk.f32.gmra.mxu0 %vm611_vm0, %v1845_v63 }
 0x1ab   : > { %2681 = vmatmul.msk.f32.gmra.mxu3 %vm611_vm0, %v3571_v22 }
 0x1ac   : > { %2697 = vmatmul.msk.f32.gmra.mxu1 %vm611_vm0, %v3418_v51 }
 0x1ad   : > { %2713 = vmatmul.msk.f32.gmra.mxu2 %vm611_vm0, %v3641_v17 }
 0x1b1   : > { %v1051_v11 = vpop.f32.mrf.mxu1 }
 0x1b3   : > { %2730 = vmatmul.msk.f32.vlgmr.msra.gmra.mxu3 %vm611_vm0, %v3453_v29 }
 0x1b4   : > { %2746 = vmatmul.msk.f32.vlgmr.msra.gmra.mxu1 %vm611_vm0, %v3459_v30 }
 0x1b5   : > { %2762 = vmatmul.msk.f32.vlgmr.msra.gmra.mxu2 %vm611_vm0, %v3324_v36 }
 0x1b6   : > { %v938_v63 = vpop.f32.mrf.mxu3 }
 0x1b7   : > { %v1052_v10 = vadd.f32 %v1051_v11, %v938_v63 }
 0x1b8   : > { %v1181_v9 = vpop.f32.mrf.mxu2 }
 0x1b9   : > { %v1054_v12 = vpop.f32.mrf.mxu1  ;;  %v3651_v8 = vadd.f32 %v1181_v9, %v1052_v10 }
 0x1bb   : > { %2731 = vmatmul.msk.f32.gmra.mxu3 %vm611_vm0, %v3467_v34 }
 0x1bc   : > { %2747 = vmatmul.msk.f32.gmra.mxu1 %vm611_vm0, %v3473_v35 }
 0x1bd   : > { %2763 = vmatmul.msk.f32.gmra.mxu2 %vm611_vm0, %v3330_v40 }
 0x1be   : > { %v941_v29 = vpop.f32.mrf.mxu3 }
 0x1bf   : > { %v1055_v30 = vadd.f32 %v1054_v12, %v941_v29 }
 0x1c0   : > { %v1184_v24 = vpop.f32.mrf.mxu2 }
 0x1c1   : > { %v1057_v7 = vpop.f32.mrf.mxu1  ;;  %v3659_v36 = vadd.f32 %v1184_v24, %v1055_v30 }
 0x1c3   : > { %2732 = vmatmul.msk.f32.gmra.mxu3 %vm611_vm0, %v3435_v14 }
 0x1c4   : > { %2748 = vmatmul.msk.f32.gmra.mxu1 %vm611_vm0, %v3485_v37 }
 0x1c5   : > { %2764 = vmatmul.msk.f32.gmra.mxu2 %vm611_vm0, %v3336_v44 }
 0x1c6   : > { %v944_v9 = vpop.f32.mrf.mxu3 }
 0x1c7   : > { %v1058_v10 = vadd.f32 %v1057_v7, %v944_v9 }
 0x1c8   : > { %v1187_v11 = vpop.f32.mrf.mxu2 }
 0x1c9   : > { %v1060_v34 = vpop.f32.mrf.mxu1  ;;  %v3667_v40 = vadd.f32 %v1187_v11, %v1058_v10 }
 0x1cb   : > { %2733 = vmatmul.msk.f32.gmra.mxu3 %vm611_vm0, %v3442_v23 }
 0x1cc   : > { %2749 = vmatmul.msk.f32.gmra.mxu1 %vm611_vm0, %v3497_v38 }
 0x1cd   : > { %2765 = vmatmul.msk.f32.gmra.mxu2 %vm611_vm0, %v3342_v48 }
 0x1ce   : > { %v947_v12 = vpop.f32.mrf.mxu3 }
 0x1cf   : > { %v1061_v14 = vadd.f32 %v1060_v34, %v947_v12 }
 0x1d0   : > { %v1190_v35 = vpop.f32.mrf.mxu2 }
 0x1d1   : > { %v1063_v24 = vpop.f32.mrf.mxu1  ;;  %v3675_v44 = vadd.f32 %v1190_v35, %v1061_v14 }
 0x1d3   : > { %2734 = vmatmul.msk.f32.gmra.mxu3 %vm611_vm0, %v3449_v27 }
 0x1d4   : > { %2750 = vmatmul.msk.f32.gmra.mxu1 %vm611_vm0, %v3511_v43 }
 0x1d5   : > { %2766 = vmatmul.msk.f32.gmra.mxu2 %vm611_vm0, %v3348_v52 }
 0x1d6   : > { %v950_v7 = vpop.f32.mrf.mxu3 }
 0x1d7   : > { %v1064_v23 = vadd.f32 %v1063_v24, %v950_v7 }
 0x1d8   : > { %v1193_v63 = vpop.f32.mrf.mxu2 }
 0x1d9   : > { %v1066_v29 = vpop.f32.mrf.mxu1  ;;  %v3683_v48 = vadd.f32 %v1193_v63, %v1064_v23 }
 0x1db   : > { %2735 = vmatmul.msk.f32.gmra.mxu3 %vm611_vm0, %v3463_v33 }
 0x1dc   : > { %2751 = vmatmul.msk.f32.gmra.mxu1 %vm611_vm0, %v3523_v46 }
 0x1dd   : > { %2767 = vmatmul.msk.f32.gmra.mxu2 %vm611_vm0, %v3355_v56 }
 0x1de   : > { %v953_v27 = vpop.f32.mrf.mxu3 }
 0x1df   : > { %v1067_v30 = vadd.f32 %v1066_v29, %v953_v27 }
 0x1e0   : > { %v1196_v9 = vpop.f32.mrf.mxu2 }
 0x1e1   : > { %v1069_v10 = vpop.f32.mrf.mxu1  ;;  %v3691_v52 = vadd.f32 %v1196_v9, %v1067_v30  ;;  %v1698_v9 = vld [vmem:[#allocation2 + $0xd8] sm:$0xff] }
 0x1e3   : > { %2736 = vmatmul.msk.f32.gmra.mxu3 %vm611_vm0, %v3477_v28 }
 0x1e4   : > { %2752 = vmatmul.msk.f32.gmra.mxu1 %vm611_vm0, %v3537_v50 }
 0x1e5   : > { %2768 = vmatmul.msk.f32.gmra.mxu2 %vm611_vm0, %v3361_v60 }
 0x1e6   : > { %v956_v33 = vpop.f32.mrf.mxu3 }
 0x1e7   : > { %v1070_v11 = vadd.f32 %v1069_v10, %v956_v33  ;;  %v3760_v10 = vld [vmem:[#allocation2 + $0xc2] sm:$0xff] }
 0x1e8   : > { %v1199_v34 = vpop.f32.mrf.mxu2 }
 0x1e9   : > { %v1072_v12 = vpop.f32.mrf.mxu1  ;;  %v3699_v56 = vadd.f32 %v1199_v34, %v1070_v11  ;;  %v3772_v34 = vld [vmem:[#allocation2 + $0xca] sm:$0xff] }
 0x1eb   : > { %2737 = vmatmul.msk.f32.gmra.mxu3 %vm611_vm0, %v3489_v32 }
 0x1ec   : > { %2753 = vmatmul.msk.f32.gmra.mxu1 %vm611_vm0, %v3551_v55 }
 0x1ed   : > { %2769 = vmatmul.msk.f32.gmra.mxu2 %vm611_vm0, %v3367_v0 }
 0x1ee   : > { %v959_v28 = vpop.f32.mrf.mxu3 }
 0x1ef   : > { %v1073_v14 = vadd.f32 %v1072_v12, %v959_v28 }
 0x1f0   : > { %v1202_v35 = vpop.f32.mrf.mxu2 }
 0x1f1   : > { %v1075_v24 = vpop.f32.mrf.mxu1  ;;  %v3707_v60 = vadd.f32 %v1202_v35, %v1073_v14  ;;  %v1375_v35 = vadd.f32 %v3505_v41, %v3651_v8 }
 0x1f3   : > { %2738 = vmatmul.msk.f32.gmra.mxu3 %vm611_vm0, %v3501_v39 }
 0x1f4   : > { %2754 = vmatmul.msk.f32.gmra.mxu1 %vm611_vm0, %v3566_v61 }
 0x1f5   : > { %2770 = vmatmul.msk.f32.gmra.mxu2 %vm611_vm0, %v3378_v21 }
 0x1f6   : > { %v962_v32 = vpop.f32.mrf.mxu3 }
 0x1f7   : > { %v3715_v7 = vadd.f32 %v1075_v24, %v962_v32  ;;  %v1376_v32 = vadd.f32 %v3527_v47, %v3659_v36 }
 0x1f9   : > { %v1078_v23 = vpop.f32.mrf.mxu1 }
 0x1fb   : > { %2739 = vmatmul.msk.f32.gmra.mxu3 %vm611_vm0, %v3515_v45 }
 0x1fc   : > { %2755 = vmatmul.msk.f32.gmra.mxu1 %vm611_vm0, %v3581_v19 }
 0x1fd   : > { %2771 = vmatmul.msk.f32.gmra.mxu2 %vm611_vm0, %v3389_v31 }
 0x1fe   : > { %v965_v0 = vpop.f32.mrf.mxu3 }
 0x1ff   : > { %v3723_v39 = vadd.f32 %v1078_v23, %v965_v0  ;;  %v1205_v0 = vpop.f32.mrf.mxu2 }
 0x201   : > { %v1081_v63 = vpop.f32.mrf.mxu1 }
 0x203   : > { %2740 = vmatmul.msk.f32.gmra.mxu3 %vm611_vm0, %v3529_v49 }
 0x204   : > { %2756 = vmatmul.msk.f32.gmra.mxu1 %vm611_vm0, %v3601_v25 }
 0x205   : > { %2772 = vmatmul.msk.f32.gmra.mxu2 %vm611_vm0, %v3403_v42 }
 0x206   : > { %v968_v21 = vpop.f32.mrf.mxu3 }
 0x207   : > { %v3731_v45 = vadd.f32 %v1081_v63, %v968_v21  ;;  %v1208_v41 = vpop.f32.mrf.mxu2 }
 0x209   : > { %v1084_v29 = vpop.f32.mrf.mxu1 }
 0x20b   : > { %2741 = vmatmul.msk.f32.gmra.mxu3 %vm611_vm0, %v3543_v54 }
 0x20c   : > { %2757 = vmatmul.msk.f32.gmra.mxu1 %vm611_vm0, %v3619_v13 }
 0x20d   : > { %2773 = vmatmul.msk.f32.gmra.mxu2 %vm611_vm0, %v3418_v51  ;;  %v2174_v51 = vld [vmem:[%s4126_s7] sm:$0xff] }
 0x20e   : > { %v971_v31 = vpop.f32.mrf.mxu3  ;;  %2304 = vmatpush.msrb.mxu2 %v2174_v51 }
 0x20f   : > { %v3739_v49 = vadd.f32 %v1084_v29, %v971_v31 }
 0x211   : > { %v1087_v27 = vpop.f32.mrf.mxu1 }
 0x213   : > { %2742 = vmatmul.msk.f32.gmra.mxu3 %vm611_vm0, %v3556_v58 }
 0x214   : > { %2758 = vmatmul.msk.f32.gmra.mxu1 %vm611_vm0, %v3630_v20 }
 0x215   : > { %2774 = vmatmul.msk.f32.gmra.mxu2 %vm611_vm0, %v3424_v57 }
 0x216   : > { %v974_v42 = vpop.f32.mrf.mxu3 }
 0x217   : > { %v3747_v54 = vadd.f32 %v1087_v27, %v974_v42 }
 0x219   : > { %v1090_v30 = vpop.f32.mrf.mxu1 }
 0x21b   : > { %2743 = vmatmul.msk.f32.gmra.mxu3 %vm611_vm0, %v3571_v22  ;;  %v2175_v22 = vld [vmem:[%s4127_s8] sm:$0xff] }
 0x21c   : > { %2759 = vmatmul.msk.f32.gmra.mxu1 %vm611_vm0, %v3641_v17 }
 0x21d   : > { %2775 = vmatmul.msk.f32.gmra.mxu2 %vm611_vm0, %v3430_v62  ;;  %2191 = vmatpush.msrb.mxu1 %v2175_v22 }
 0x21e   : > { %v977_v58 = vpop.f32.mrf.mxu3 }
 0x21f   : > { %v3758_v57 = vadd.f32 %v1090_v30, %v977_v58  ;;  %v1237_v58 = vadd.f32 %v1205_v0, %v3715_v7  ;;  %v4171_v7 = vld [vmem:[#allocation12_spill] sm:$0xff] }
 0x221   : > { %v1093_v33 = vpop.f32.mrf.mxu1 }
 0x223   : > { %2744 = vmatmul.msk.f32.gmra.mxu3 %vm611_vm0, %v3590_v18  ;;  %v1699_v18 = vld [vmem:[#allocation2 + $0xe0] sm:$0xff] }
 0x224   : > { %2760 = vmatmul.msk.f32.gmra.mxu1 %vm611_vm0, %v3760_v10 }
 0x225   : > { %2776 = vmatmul.msk.f32.gmra.mxu2 %vm611_vm0, %v1698_v9  ;;  %v4170_v9 = vld [vmem:[#allocation11_spill] sm:$0xff] }
 0x226   : > { %v980_v62 = vpop.f32.mrf.mxu3 }
 0x227   : > { %v3770_v11 = vadd.f32 %v1093_v33, %v980_v62 }
 0x229   : > { %v1096_v12 = vpop.f32.mrf.mxu1 }
 0x22b   : > { %2745 = vmatmul.msk.f32.gmra.mxu3 %vm611_vm0, %v3611_v16 }
 0x22c   : > { %2761 = vmatmul.msk.f32.gmra.mxu1 %vm611_vm0, %v3772_v34 }
 0x22d   : > { %2777 = vmatmul.msk.f32.gmra.mxu2 %vm611_vm0, %v1699_v18 }
 0x22e   : > { %v983_v28 = vpop.f32.mrf.mxu3 }
 0x22f   : > { %v3779_v14 = vadd.f32 %v1096_v12, %v983_v28 }
 0x233   : > { %2794 = vmatmul.msk.f32.vlgmr.msrb.gmra.mxu3 %vm611_vm0, %v3485_v37 }
 0x234   : > { %2810 = vmatmul.msk.f32.vlgmr.msrb.gmra.mxu1 %vm611_vm0, %v3191_v1  ;;  %v1377_v1 = vadd.f32 %v3541_v53, %v3667_v40  ;;  %v1211_v53 = vpop.f32.mrf.mxu2 }
 0x236   : > { %v1473_v16 = vpop.f32.mrf.mxu3 }
 0x237   : > { %v3787_v24 = vadd.f32 %v1473_v16, %v1375_v35 }
 0x23b   : > { %2795 = vmatmul.msk.f32.gmra.mxu3 %vm611_vm0, %v3497_v38 }
 0x23c   : > { %2811 = vmatmul.msk.f32.gmra.mxu1 %vm611_vm0, %v3196_v2  ;;  %v1351_v2 = vpop.f32.mrf.mxu0 }
 0x23d   : > { %v1383_v22 = vadd.f32 %v1351_v2, %v1237_v58 }
 0x23e   : > { %v1476_v23 = vpop.f32.mrf.mxu3 }
 0x23f   : > { %v3795_v37 = vadd.f32 %v1476_v23, %v1376_v32  ;;  %v1239_v32 = vadd.f32 %v1211_v53, %v3731_v45  ;;  %v4173_v45 = vld [vmem:[#allocation14_spill] sm:$0xff] }
 0x243   : > { %2796 = vmatmul.msk.f32.gmra.mxu3 %vm611_vm0, %v3511_v43  ;;  %v1378_v43 = vadd.f32 %v3558_v59, %v3675_v44 }
 0x244   : > { %2812 = vmatmul.msk.f32.gmra.mxu1 %vm611_vm0, %v3201_v3  ;;  %v1354_v3 = vpop.f32.mrf.mxu0 }
 0x246   : > { %v1479_v8 = vpop.f32.mrf.mxu3 }
 0x247   : > { %v3803_v38 = vadd.f32 %v1479_v8, %v1377_v1 }
 0x24b   : > { %2797 = vmatmul.msk.f32.gmra.mxu3 %vm611_vm0, %v3523_v46  ;;  %v1379_v46 = vadd.f32 %v3575_v26, %v3683_v48  ;;  %v4166_v26 = vld [vmem:[#allocation9_spill] sm:$0xff]  ;;  %v3833_v48 = vpop.f32.mrf.mxu1 }
 0x24c   : > { %2813 = vmatmul.msk.f32.gmra.mxu1 %vm611_vm0, %v3206_v4  ;;  %v1357_v59 = vpop.f32.mrf.mxu0 }
 0x24e   : > { %v1482_v47 = vpop.f32.mrf.mxu3 }
 0x24f   : > { %v3811_v36 = vadd.f32 %v1482_v47, %v1378_v43 }
 0x253   : > { %2798 = vmatmul.msk.f32.gmra.mxu3 %vm611_vm0, %v3537_v50  ;;  %v1380_v50 = vadd.f32 %v3608_v15, %v3691_v52  ;;  %v4168_v52 = vld [vmem:[#allocation10_spill] sm:$0xff]  ;;  %v3845_v30 = vpop.f32.mrf.mxu1 }
 0x254   : > { %2814 = vmatmul.msk.f32.gmra.mxu1 %vm611_vm0, %v3211_v5  ;;  %v1214_v5 = vpop.f32.mrf.mxu2 }
 0x256   : > { %v1485_v40 = vpop.f32.mrf.mxu3 }
 0x257   : > { %v3819_v4 = vadd.f32 %v1485_v40, %v1379_v46 }
 0x25b   : > { %2799 = vmatmul.msk.f32.gmra.mxu3 %vm611_vm0, %v3551_v55  ;;  %v4167_v55 = vld [vmem:[#allocation19_spill] sm:$0xff]  ;;  %v3857_v18 = vpop.f32.mrf.mxu1 }
 0x25c   : > { %2815 = vmatmul.msk.f32.gmra.mxu1 %vm611_vm0, %v3216_v6  ;;  %v1381_v21 = vadd.f32 %v4167_v55, %v3699_v56  ;;  %v1360_v6 = vpop.f32.mrf.mxu0  ;;  %v1217_v15 = vpop.f32.mrf.mxu2 }
 0x25d   : > { %v1241_v53 = vadd.f32 %v1217_v15, %v3747_v54  ;;  %v4175_v54 = vld [vmem:[#allocation16_spill] sm:$0xff] }
 0x25e   : > { %v1488_v44 = vpop.f32.mrf.mxu3 }
 0x25f   : > { %v3827_v63 = vadd.f32 %v1488_v44, %v1380_v50 }
 0x263   : > { %2800 = vmatmul.msk.f32.gmra.mxu3 %vm611_vm0, %v3566_v61  ;;  %v4169_v61 = vld [vmem:[#allocation20_spill] sm:$0xff]  ;;  %v3866_v23 = vpop.f32.mrf.mxu1 }
 0x264   : > { %2816 = vmatmul.msk.f32.gmra.mxu1 %vm611_vm0, %v4166_v26  ;;  %v1382_v27 = vadd.f32 %v4169_v61, %v3707_v60  ;;  %v1363_v56 = vpop.f32.mrf.mxu0  ;;  %v1238_v60 = vadd.f32 %v1208_v41, %v3723_v39  ;;  %v4172_v39 = vld [vmem:[#allocation13_spill] sm:$0xff]  ;;  %v1240_v41 = vadd.f32 %v1214_v5, %v3739_v49  ;;  %v4174_v49 = vld [vmem:[#allocation15_spill] sm:$0xff] }
 0x265   : > { %v1990_v61 = vld [vmem:[#allocation2 + $0xda] sm:$0xff] }
 0x266   : > { %v1491_v29 = vpop.f32.mrf.mxu3 }
 0x267   : > { %v3837_v31 = vadd.f32 %v1491_v29, %v1381_v21 }
 0x26b   : > { %2801 = vmatmul.msk.f32.gmra.mxu3 %vm611_vm0, %v3581_v19  ;;  %v1220_v19 = vpop.f32.mrf.mxu2  ;;  %v3879_v43 = vpop.f32.mrf.mxu1 }
 0x26c   : > { %2817 = vmatmul.msk.f32.gmra.mxu1 %vm611_vm0, %v4168_v52  ;;  %v1366_v12 = vpop.f32.mrf.mxu0  ;;  %v1242_v26 = vadd.f32 %v1220_v19, %v3758_v57  ;;  %v4176_v57 = vld [vmem:[#allocation17_spill] sm:$0xff] }
 0x26e   : > { %v1494_v42 = vpop.f32.mrf.mxu3 }
 0x26f   : > { %v3847_v51 = vadd.f32 %v1494_v42, %v1382_v27 }
 0x273   : > { %2802 = vmatmul.msk.f32.gmra.mxu3 %vm611_vm0, %v3601_v25  ;;  %v1384_v25 = vadd.f32 %v1354_v3, %v1238_v60  ;;  %v1223_v28 = vpop.f32.mrf.mxu2  ;;  %v3888_v50 = vpop.f32.mrf.mxu1 }
 0x274   : > { %2818 = vmatmul.msk.f32.gmra.mxu1 %vm611_vm0, %v4170_v9  ;;  %v1369_v0 = vpop.f32.mrf.mxu0  ;;  %v1243_v29 = vadd.f32 %v1223_v28, %v3770_v11  ;;  %v1991_v9 = vld [vmem:[#allocation2 + $0xe2] sm:$0xff]  ;;  %v4177_v11 = vld [vmem:[#allocation18_spill] sm:$0xff] }
 0x276   : > { %v1497_v33 = vpop.f32.mrf.mxu3 }
 0x277   : > { %v3854_v62 = vadd.f32 %v1497_v33, %v1383_v22  ;;  %v1667_v33 = vadd.f32 %v3833_v48, %v3787_v24 }
 0x27b   : > { %2803 = vmatmul.msk.f32.gmra.mxu3 %vm611_vm0, %v3619_v13  ;;  %v1385_v13 = vadd.f32 %v1357_v59, %v1239_v32  ;;  %v1226_v2 = vpop.f32.mrf.mxu2  ;;  %v3900_v15 = vpop.f32.mrf.mxu1  ;;  %v3922_v32 = vld [vmem:[%s4125_s6] ss:$0 sm:$0xff] }
 0x27c   : > { %2819 = vmatmul.msk.f32.gmra.mxu1 %vm611_vm0, %v4171_v7  ;;  %v1372_v47 = vpop.f32.mrf.mxu0  ;;  %v1244_v58 = vadd.f32 %v1226_v2, %v3779_v14  ;;  %v1668_v14 = vadd.f32 %v3845_v30, %v3795_v37  ;;  %v1669_v30 = vadd.f32 %v3857_v18, %v3803_v38 }
 0x27e   : > { %v1500_v35 = vpop.f32.mrf.mxu3  ;;  %v1390_v60 = vadd.f32 %v1372_v47, %v1244_v58 }
 0x27f   : > { %v3863_v16 = vadd.f32 %v1500_v35, %v1384_v25 }
 0x283   : > { %2804 = vmatmul.msk.f32.gmra.mxu3 %vm611_vm0, %v3630_v20  ;;  %v1386_v20 = vadd.f32 %v1360_v6, %v1240_v41  ;;  %v1766_v40 = vpop.f32.mrf.mxu2  ;;  %v3908_v19 = vpop.f32.mrf.mxu1 }
 0x284   : > { %2820 = vmatmul.msk.f32.gmra.mxu1 %vm611_vm0, %v4172_v39  ;;  %v1912_v5 = vpop.f32.mrf.mxu0  ;;  %v1814_v28 = vadd.f32 %v1766_v40, %v1667_v33 }
 0x286   : > { %v1503_v1 = vpop.f32.mrf.mxu3  ;;  %v1960_v35 = vadd.f32 %v1912_v5, %v1814_v28 }
 0x287   : > { %v3872_v8 = vadd.f32 %v1503_v1, %v1385_v13 }
 0x28b   : > { %2805 = vmatmul.msk.f32.gmra.mxu3 %vm611_vm0, %v3641_v17  ;;  %v1387_v17 = vadd.f32 %v1363_v56, %v1241_v53  ;;  %v1769_v55 = vpop.f32.mrf.mxu2 }
 0x28c   : > { %2821 = vmatmul.msk.f32.gmra.mxu1 %vm611_vm0, %v4173_v45  ;;  %v1915_v52 = vpop.f32.mrf.mxu0  ;;  %v1815_v1 = vadd.f32 %v1769_v55, %v1668_v14  ;;  %v1671_v55 = vadd.f32 %v3879_v43, %v3819_v4 }
 0x28e   : > { %v1506_v3 = vpop.f32.mrf.mxu3  ;;  %v1961_v2 = vadd.f32 %v1915_v52, %v1815_v1 }
 0x28f   : > { %v3881_v46 = vadd.f32 %v1506_v3, %v1386_v20 }
 0x293   : > { %2806 = vmatmul.msk.f32.gmra.mxu3 %vm611_vm0, %v3760_v10  ;;  %v1388_v10 = vadd.f32 %v1366_v12, %v1242_v26  ;;  %v1772_v27 = vpop.f32.mrf.mxu2 }
 0x294   : > { %2822 = vmatmul.msk.f32.gmra.mxu1 %vm611_vm0, %v4174_v49  ;;  %v1918_v22 = vpop.f32.mrf.mxu0  ;;  %v1816_v47 = vadd.f32 %v1772_v27, %v1669_v30  ;;  %v1670_v49 = vadd.f32 %v3866_v23, %v3811_v36  ;;  %v1672_v27 = vadd.f32 %v3888_v50, %v3827_v63 }
 0x296   : > { %v1509_v59 = vpop.f32.mrf.mxu3  ;;  %v1962_v38 = vadd.f32 %v1918_v22, %v1816_v47 }
 0x297   : > { %v3890_v44 = vadd.f32 %v1509_v59, %v1387_v17 }
 0x29b   : > { %2807 = vmatmul.msk.f32.gmra.mxu3 %vm611_vm0, %v3772_v34  ;;  %v1389_v34 = vadd.f32 %v1369_v0, %v1243_v29  ;;  %v1775_v25 = vpop.f32.mrf.mxu2 }
 0x29c   : > { %2823 = vmatmul.msk.f32.gmra.mxu1 %vm611_vm0, %v4175_v54  ;;  %v1921_v39 = vpop.f32.mrf.mxu0  ;;  %v1817_v59 = vadd.f32 %v1775_v25, %v1670_v49 }
 0x29e   : > { %v1512_v21 = vpop.f32.mrf.mxu3  ;;  %v1963_v36 = vadd.f32 %v1921_v39, %v1817_v59 }
 0x29f   : > { %v3897_v6 = vadd.f32 %v1512_v21, %v1388_v10 }
 0x2a3   : > { %2808 = vmatmul.msk.f32.gmra.mxu3 %vm611_vm0, %v1990_v61  ;;  %v1778_v37 = vpop.f32.mrf.mxu2  ;;  %v1643_v61 = vpop.f32.mrf.mxu1 }
 0x2a4   : > { %2824 = vmatmul.msk.f32.gmra.mxu1 %vm611_vm0, %v4176_v57  ;;  %v1924_v20 = vpop.f32.mrf.mxu0  ;;  %v1818_v29 = vadd.f32 %v1778_v37, %v1671_v55 }
 0x2a6   : > { %v1515_v42 = vpop.f32.mrf.mxu3  ;;  %v1964_v4 = vadd.f32 %v1924_v20, %v1818_v29 }
 0x2a7   : > { %v3905_v56 = vadd.f32 %v1515_v42, %v1389_v34 }
 0x2ab   : > { %2809 = vmatmul.msk.f32.gmra.mxu3 %vm611_vm0, %v1991_v9  ;;  %v1781_v40 = vpop.f32.mrf.mxu2  ;;  %v1646_v33 = vpop.f32.mrf.mxu1 }
 0x2ac   : > { %2825 = vmatmul.msk.f32.gmra.mxu1 %vm611_vm0, %v4177_v11  ;;  %v1927_v26 = vpop.f32.mrf.mxu0  ;;  %v1819_v9 = vadd.f32 %v1781_v40, %v1672_v27  ;;  %v1676_v49 = vadd.f32 %v1646_v33, %v3863_v16 }
 0x2ae   : > { %v1518_v12 = vpop.f32.mrf.mxu3  ;;  %v1965_v63 = vadd.f32 %v1927_v26, %v1819_v9 }
 0x2af   : > { %v3915_v7 = vadd.f32 %v1518_v12, %v1390_v60  ;;  %v1673_v60 = vadd.f32 %v3900_v15, %v3837_v31 }
 0x2b3   : > { %v1784_v23 = vpop.f32.mrf.mxu2  ;;  %v1649_v15 = vpop.f32.mrf.mxu1 }
 0x2b4   : > { %v1930_v34 = vpop.f32.mrf.mxu0  ;;  %v1820_v28 = vadd.f32 %v1784_v23, %v1673_v60 }
 0x2b6   : > { %v2058_v0 = vpop.f32.mrf.mxu3  ;;  %v1966_v31 = vadd.f32 %v1930_v34, %v1820_v28 }
 0x2b7   : > { %v2106_v13 = vadd.f32 %v2058_v0, %v1960_v35  ;;  %v1674_v0 = vadd.f32 %v3908_v19, %v3847_v51 }
 0x2b9   : > { %v2126_v24 = vadd.f32 %v3922_v32, %v2106_v13 }
 0x2bb   : > { %v2142_v48 = vmax.f32 %v2126_v24, 0.0  ;;  %v1787_v58 = vpop.f32.mrf.mxu2  ;;  %v1652_v20 = vpop.f32.mrf.mxu1 }
 0x2bc   : > { %v1933_v50 = vpop.f32.mrf.mxu0  ;;  %v1821_v37 = vadd.f32 %v1787_v58, %v1674_v0  ;;  %v1678_v34 = vadd.f32 %v1652_v20, %v3881_v46 }
 0x2bd   : > { %2158 = vst.msk [vmem:[%s3930_s27] sm:$0xff] %vm611_vm0, %v2142_v48  ;;  %2826 = vmatmul.msk.f32.vlgmr.msrb.gmra.mxu2 %vm611_vm0, %v2142_v48 }
 0x2be   : > { %v2061_v41 = vpop.f32.mrf.mxu3  ;;  %v1967_v51 = vadd.f32 %v1933_v50, %v1821_v37 }
 0x2bf   : > { %v2107_v45 = vadd.f32 %v2061_v41, %v1961_v2  ;;  %v1675_v41 = vadd.f32 %v1643_v61, %v3854_v62 }
 0x2c1   : > { %v2127_v3 = vadd.f32 %v3922_v32, %v2107_v45 }
 0x2c3   : > { %v2143_v53 = vmax.f32 %v2127_v3, 0.0  ;;  %v1790_v35 = vpop.f32.mrf.mxu2  ;;  %v1655_v26 = vpop.f32.mrf.mxu1 }
 0x2c4   : > { %v1936_v24 = vpop.f32.mrf.mxu0  ;;  %v1822_v47 = vadd.f32 %v1790_v35, %v1675_v41 }
 0x2c5   : > { %2159 = vst.msk [vmem:[%s3930_s27 + $0x8] sm:$0xff] %vm611_vm0, %v2143_v53  ;;  %2827 = vmatmul.msk.f32.gmra.mxu2 %vm611_vm0, %v2143_v53 }
 0x2c6   : > { %v2064_v18 = vpop.f32.mrf.mxu3  ;;  %v1968_v62 = vadd.f32 %v1936_v24, %v1822_v47 }
 0x2c7   : > { %v2108_v17 = vadd.f32 %v2064_v18, %v1962_v38 }
 0x2c9   : > { %v2128_v5 = vadd.f32 %v3922_v32, %v2108_v17 }
 0x2cb   : > { %v2144_v54 = vmax.f32 %v2128_v5, 0.0  ;;  %v1793_v2 = vpop.f32.mrf.mxu2 }
 0x2cc   : > { %v1939_v53 = vpop.f32.mrf.mxu0  ;;  %v1823_v59 = vadd.f32 %v1793_v2, %v1676_v49 }
 0x2cd   : > { %2160 = vst.msk [vmem:[%s3930_s27 + $0x10] sm:$0xff] %vm611_vm0, %v2144_v54  ;;  %2828 = vmatmul.msk.f32.gmra.mxu2 %vm611_vm0, %v2144_v54 }
 0x2ce   : > { %v2067_v10 = vpop.f32.mrf.mxu3  ;;  %v1969_v16 = vadd.f32 %v1939_v53, %v1823_v59 }
 0x2cf   : > { %v2109_v21 = vadd.f32 %v2067_v10, %v1963_v36  ;;  %v1677_v36 = vadd.f32 %v1649_v15, %v3872_v8 }
 0x2d1   : > { %v2129_v52 = vadd.f32 %v3922_v32, %v2109_v21 }
 0x2d3   : > { %v2145_v57 = vmax.f32 %v2129_v52, 0.0  ;;  %v1796_v38 = vpop.f32.mrf.mxu2 }
 0x2d4   : > { %v1942_v55 = vpop.f32.mrf.mxu0  ;;  %v1824_v29 = vadd.f32 %v1796_v38, %v1677_v36 }
 0x2d5   : > { %2161 = vst.msk [vmem:[%s3930_s27 + $0x18] sm:$0xff] %vm611_vm0, %v2145_v57  ;;  %2829 = vmatmul.msk.f32.gmra.mxu2 %vm611_vm0, %v2145_v57  ;;  %v1658_v57 = vpop.f32.mrf.mxu1 }
 0x2d6   : > { %v2070_v43 = vpop.f32.mrf.mxu3  ;;  %v1970_v8 = vadd.f32 %v1942_v55, %v1824_v29  ;;  %v1680_v35 = vadd.f32 %v1658_v57, %v3897_v6 }
 0x2d7   : > { %v2110_v42 = vadd.f32 %v2070_v43, %v1964_v4 }
 0x2d9   : > { %v2130_v11 = vadd.f32 %v3922_v32, %v2110_v42 }
 0x2db   : > { %v2146_v22 = vmax.f32 %v2130_v11, 0.0  ;;  %v1799_v21 = vpop.f32.mrf.mxu2 }
 0x2dc   : > { %v1945_v27 = vpop.f32.mrf.mxu0  ;;  %v1825_v42 = vadd.f32 %v1799_v21, %v1678_v34 }
 0x2dd   : > { %2162 = vst.msk [vmem:[%s3930_s27 + $0x20] sm:$0xff] %vm611_vm0, %v2146_v22  ;;  %2830 = vmatmul.msk.f32.gmra.mxu2 %vm611_vm0, %v2146_v22  ;;  %v1679_v22 = vadd.f32 %v1655_v26, %v3890_v44  ;;  %v1661_v33 = vpop.f32.mrf.mxu1 }
 0x2de   : > { %v2073_v12 = vpop.f32.mrf.mxu3  ;;  %v1971_v46 = vadd.f32 %v1945_v27, %v1825_v42  ;;  %v1681_v37 = vadd.f32 %v1661_v33, %v3905_v56 }
 0x2df   : > { %v2111_v25 = vadd.f32 %v2073_v12, %v1965_v63 }
 0x2e1   : > { %v2131_v14 = vadd.f32 %v3922_v32, %v2111_v25 }
 0x2e3   : > { %v2147_v39 = vmax.f32 %v2131_v14, 0.0  ;;  %v1802_v9 = vpop.f32.mrf.mxu2 }
 0x2e4   : > { %v1948_v50 = vpop.f32.mrf.mxu0  ;;  %v1826_v12 = vadd.f32 %v1802_v9, %v1679_v22 }
 0x2e5   : > { %2163 = vst.msk [vmem:[%s3930_s27 + $0x28] sm:$0xff] %vm611_vm0, %v2147_v39  ;;  %2831 = vmatmul.msk.f32.gmra.mxu2 %vm611_vm0, %v2147_v39 }
 0x2e6   : > { %v2076_v13 = vpop.f32.mrf.mxu3  ;;  %v1972_v44 = vadd.f32 %v1948_v50, %v1826_v12 }
 0x2e7   : > { %v2112_v1 = vadd.f32 %v2076_v13, %v1966_v31  ;;  %v1664_v31 = vpop.f32.mrf.mxu1 }
 0x2e8   : > { %v1682_v47 = vadd.f32 %v1664_v31, %v3915_v7 }
 0x2e9   : > { %v2132_v48 = vadd.f32 %v3922_v32, %v2112_v1 }
 0x2eb   : > { %v2148_v30 = vmax.f32 %v2132_v48, 0.0  ;;  %v1805_v14 = vpop.f32.mrf.mxu2 }
 0x2ec   : > { %v1827_v15 = vadd.f32 %v1805_v14, %v1680_v35  ;;  %v1951_v1 = vpop.f32.mrf.mxu0 }
 0x2ed   : > { %2164 = vst.msk [vmem:[%s3930_s27 + $0x30] sm:$0xff] %vm611_vm0, %v2148_v30  ;;  %2832 = vmatmul.msk.f32.gmra.mxu2 %vm611_vm0, %v2148_v30 }
 0x2ee   : > { %v2079_v19 = vpop.f32.mrf.mxu3  ;;  %v1973_v6 = vadd.f32 %v1951_v1, %v1827_v15 }
 0x2ef   : > { %v2113_v45 = vadd.f32 %v2079_v19, %v1967_v51  ;;  %v2193_v41 = vpop.f32.mrf.mxu1 }
 0x2f1   : > { %v2133_v3 = vadd.f32 %v3922_v32, %v2113_v45 }
 0x2f3   : > { %v2149_v40 = vmax.f32 %v2133_v3, 0.0  ;;  %v1808_v48 = vpop.f32.mrf.mxu2 }
 0x2f4   : > { %v1828_v51 = vadd.f32 %v1808_v48, %v1681_v37  ;;  %v1954_v45 = vpop.f32.mrf.mxu0 }
 0x2f5   : > { %2165 = vst.msk [vmem:[%s3930_s27 + $0x38] sm:$0xff] %vm611_vm0, %v2149_v40  ;;  %2833 = vmatmul.msk.f32.gmra.mxu2 %vm611_vm0, %v2149_v40 }
 0x2f6   : > { %v2082_v18 = vpop.f32.mrf.mxu3  ;;  %v1974_v56 = vadd.f32 %v1954_v45, %v1828_v51 }
 0x2f7   : > { %v2114_v17 = vadd.f32 %v2082_v18, %v1968_v62  ;;  %v2196_v38 = vpop.f32.mrf.mxu1 }
 0x2f9   : > { %v2134_v5 = vadd.f32 %v3922_v32, %v2114_v17 }
 0x2fb   : > { %v2150_v54 = vmax.f32 %v2134_v5, 0.0  ;;  %v1811_v40 = vpop.f32.mrf.mxu2 }
 0x2fc   : > { %v1829_v49 = vadd.f32 %v1811_v40, %v1682_v47  ;;  %v1957_v17 = vpop.f32.mrf.mxu0 }
 0x2fd   : > { %2166 = vst.msk [vmem:[%s3930_s27 + $0x40] sm:$0xff] %vm611_vm0, %v2150_v54  ;;  %2834 = vmatmul.msk.f32.gmra.mxu2 %vm611_vm0, %v2150_v54 }
 0x2fe   : > { %v2085_v23 = vpop.f32.mrf.mxu3  ;;  %v1975_v7 = vadd.f32 %v1957_v17, %v1829_v49 }
 0x2ff   : > { %v2115_v10 = vadd.f32 %v2085_v23, %v1969_v16  ;;  %v2199_v55 = vpop.f32.mrf.mxu1  ;;  %v4019_v16 = vld [vmem:[%s4128_s9] ss:$0 sm:$0xff] }
 0x301   : > { %v2135_v52 = vadd.f32 %v3922_v32, %v2115_v10 }
 0x303   : > { %v2151_v61 = vmax.f32 %v2135_v52, 0.0 }
 0x305   : > { %2167 = vst.msk [vmem:[%s3930_s27 + $0x48] sm:$0xff] %vm611_vm0, %v2151_v61  ;;  %2835 = vmatmul.msk.f32.gmra.mxu2 %vm611_vm0, %v2151_v61 }
 0x306   : > { %v2088_v4 = vpop.f32.mrf.mxu3 }
 0x307   : > { %v2116_v43 = vadd.f32 %v2088_v4, %v1970_v8  ;;  %v2202_v36 = vpop.f32.mrf.mxu1 }
 0x309   : > { %v2136_v58 = vadd.f32 %v3922_v32, %v2116_v43 }
 0x30b   : > { %v2152_v11 = vmax.f32 %v2136_v58, 0.0 }
 0x30d   : > { %2168 = vst.msk [vmem:[%s3930_s27 + $0x50] sm:$0xff] %vm611_vm0, %v2152_v11  ;;  %2836 = vmatmul.msk.f32.gmra.mxu2 %vm611_vm0, %v2152_v11 }
 0x30e   : > { %v2091_v60 = vpop.f32.mrf.mxu3 }
 0x30f   : > { %v2117_v63 = vadd.f32 %v2091_v60, %v1971_v46  ;;  %v2205_v52 = vpop.f32.mrf.mxu1 }
 0x311   : > { %v2137_v25 = vadd.f32 %v3922_v32, %v2117_v63 }
 0x313   : > { %v2153_v28 = vmax.f32 %v2137_v25, 0.0 }
 0x315   : > { %2169 = vst.msk [vmem:[%s3930_s27 + $0x58] sm:$0xff] %vm611_vm0, %v2153_v28  ;;  %2837 = vmatmul.msk.f32.gmra.mxu2 %vm611_vm0, %v2153_v28 }
 0x316   : > { %v2094_v39 = vpop.f32.mrf.mxu3 }
 0x317   : > { %v2118_v0 = vadd.f32 %v2094_v39, %v1972_v44  ;;  %v2208_v4 = vpop.f32.mrf.mxu1 }
 0x319   : > { %v2138_v13 = vadd.f32 %v3922_v32, %v2118_v0 }
 0x31b   : > { %v2154_v24 = vmax.f32 %v2138_v13, 0.0 }
 0x31d   : > { %2170 = vst.msk [vmem:[%s3930_s27 + $0x60] sm:$0xff] %vm611_vm0, %v2154_v24  ;;  %2838 = vmatmul.msk.f32.gmra.mxu2 %vm611_vm0, %v2154_v24 }
 0x31e   : > { %v2097_v30 = vpop.f32.mrf.mxu3 }
 0x31f   : > { %v2119_v2 = vadd.f32 %v2097_v30, %v1973_v6  ;;  %v2211_v22 = vpop.f32.mrf.mxu1 }
 0x321   : > { %v2139_v19 = vadd.f32 %v3922_v32, %v2119_v2 }
 0x323   : > { %v2155_v20 = vmax.f32 %v2139_v19, 0.0 }
 0x325   : > { %2171 = vst.msk [vmem:[%s3930_s27 + $0x68] sm:$0xff] %vm611_vm0, %v2155_v20  ;;  %2839 = vmatmul.msk.f32.gmra.mxu2 %vm611_vm0, %v2155_v20 }
 0x326   : > { %v2100_v3 = vpop.f32.mrf.mxu3 }
 0x327   : > { %v2120_v53 = vadd.f32 %v2100_v3, %v1974_v56  ;;  %v2214_v12 = vpop.f32.mrf.mxu1 }
 0x329   : > { %v2140_v62 = vadd.f32 %v3922_v32, %v2120_v53 }
 0x32b   : > { %v2156_v18 = vmax.f32 %v2140_v62, 0.0 }
 0x32d   : > { %2172 = vst.msk [vmem:[%s3930_s27 + $0x70] sm:$0xff] %vm611_vm0, %v2156_v18  ;;  %2840 = vmatmul.msk.f32.gmra.mxu2 %vm611_vm0, %v2156_v18 }
 0x32e   : > { %v2103_v59 = vpop.f32.mrf.mxu3 }
 0x32f   : > { %v2121_v5 = vadd.f32 %v2103_v59, %v1975_v7  ;;  %v2217_v39 = vpop.f32.mrf.mxu1 }
 0x331   : > { %v2141_v26 = vadd.f32 %v3922_v32, %v2121_v5 }
 0x333   : > { %v2157_v54 = vmax.f32 %v2141_v26, 0.0 }
 0x335   : > { %2173 = vst.msk [vmem:[%s3930_s27 + $0x78] sm:$0xff] %vm611_vm0, %v2157_v54  ;;  %2841 = vmatmul.msk.f32.gmra.mxu2 %vm611_vm0, %v2157_v54 }
 0x337   : > { %v2220_v24 = vpop.f32.mrf.mxu1 }
 0x340   : > { %v2306_v23 = vpop.f32.mrf.mxu2 }
 0x341   : > { %v2307_v10 = vadd.f32 %v2306_v23, %v2193_v41  ;;  %v2223_v41 = vpop.f32.mrf.mxu1 }
 0x343   : > { %v2358_v21 = vadd.f32 %v4019_v16, %v2307_v10 }
 0x345   : > { %v2374_v32 = vmax.f32 %v2358_v21, 0.0 }
 0x347   : > { %2391 = vst.msk [vmem:[%s4024_s28] sm:$0xff] %vm2390_vm2, %v2374_v32 }
 0x348   : > { %v2309_v29 = vpop.f32.mrf.mxu2 }
 0x349   : > { %v2310_v61 = vadd.f32 %v2309_v29, %v2196_v38  ;;  %v2226_v56 = vpop.f32.mrf.mxu1 }
 0x34b   : > { %v2359_v57 = vadd.f32 %v4019_v16, %v2310_v61 }
 0x34d   : > { %v2375_v34 = vmax.f32 %v2359_v57, 0.0 }
 0x34f   : > { %2392 = vst.msk [vmem:[%s4024_s28 + $0x8] sm:$0xff] %vm2390_vm2, %v2375_v34 }
 0x350   : > { %v2312_v8 = vpop.f32.mrf.mxu2 }
 0x351   : > { %v2313_v27 = vadd.f32 %v2312_v8, %v2199_v55  ;;  %v2229_v38 = vpop.f32.mrf.mxu1 }
 0x353   : > { %v2360_v43 = vadd.f32 %v4019_v16, %v2313_v27 }
 0x355   : > { %v2376_v42 = vmax.f32 %v2360_v43, 0.0 }
 0x357   : > { %2393 = vst.msk [vmem:[%s4024_s28 + $0x10] sm:$0xff] %vm2390_vm2, %v2376_v42 }
 0x358   : > { %v2315_v58 = vpop.f32.mrf.mxu2 }
 0x359   : > { %v2316_v9 = vadd.f32 %v2315_v58, %v2202_v36  ;;  %v2232_v26 = vpop.f32.mrf.mxu1 }
 0x35b   : > { %v2361_v11 = vadd.f32 %v4019_v16, %v2316_v9 }
 0x35d   : > { %v2377_v46 = vmax.f32 %v2361_v11, 0.0 }
 0x35f   : > { %2394 = vst.msk [vmem:[%s4024_s28 + $0x18] sm:$0xff] %vm2390_vm2, %v2377_v46 }
 0x360   : > { %v2318_v33 = vpop.f32.mrf.mxu2 }
 0x361   : > { %v2319_v60 = vadd.f32 %v2318_v33, %v2205_v52  ;;  %v2235_v21 = vpop.f32.mrf.mxu1 }
 0x363   : > { %v2362_v63 = vadd.f32 %v4019_v16, %v2319_v60 }
 0x365   : > { %v2378_v50 = vmax.f32 %v2362_v63, 0.0 }
 0x367   : > { %2395 = vst.msk [vmem:[%s4024_s28 + $0x20] sm:$0xff] %vm2390_vm2, %v2378_v50 }
 0x368   : > { %v2321_v25 = vpop.f32.mrf.mxu2 }
 0x369   : > { %v2322_v28 = vadd.f32 %v2321_v25, %v2208_v4  ;;  %v2238_v34 = vpop.f32.mrf.mxu1 }
 0x36b   : > { %v2363_v14 = vadd.f32 %v4019_v16, %v2322_v28 }
 0x36d   : > { %v2379_v35 = vmax.f32 %v2363_v14, 0.0 }
 0x36f   : > { %2396 = vst.msk [vmem:[%s4024_s28 + $0x28] sm:$0xff] %vm2390_vm2, %v2379_v35 }
 0x370   : > { %v2324_v44 = vpop.f32.mrf.mxu2 }
 0x371   : > { %v2325_v0 = vadd.f32 %v2324_v44, %v2211_v22 }
 0x373   : > { %v2364_v31 = vadd.f32 %v4019_v16, %v2325_v0 }
 0x375   : > { %v2380_v15 = vmax.f32 %v2364_v31, 0.0 }
 0x377   : > { %2397 = vst.msk [vmem:[%s4024_s28 + $0x30] sm:$0xff] %vm2390_vm2, %v2380_v15 }
 0x378   : > { %v2327_v13 = vpop.f32.mrf.mxu2 }
 0x379   : > { %v2328_v1 = vadd.f32 %v2327_v13, %v2214_v12 }
 0x37b   : > { %v2365_v37 = vadd.f32 %v4019_v16, %v2328_v1 }
 0x37d   : > { %v2381_v6 = vmax.f32 %v2365_v37, 0.0 }
 0x37f   : > { %2398 = vst.msk [vmem:[%s4024_s28 + $0x38] sm:$0xff] %vm2390_vm2, %v2381_v6 }
 0x380   : > { %v2330_v48 = vpop.f32.mrf.mxu2 }
 0x381   : > { %v2331_v30 = vadd.f32 %v2330_v48, %v2217_v39 }
 0x383   : > { %v2366_v2 = vadd.f32 %v4019_v16, %v2331_v30 }
 0x385   : > { %v2382_v51 = vmax.f32 %v2366_v2, 0.0 }
 0x387   : > { %2399 = vst.msk [vmem:[%s4024_s28 + $0x40] sm:$0xff] %vm2390_vm2, %v2382_v51 }
 0x388   : > { %v2333_v19 = vpop.f32.mrf.mxu2 }
 0x389   : > { %v2334_v45 = vadd.f32 %v2333_v19, %v2220_v24 }
 0x38b   : > { %v2367_v20 = vadd.f32 %v4019_v16, %v2334_v45 }
 0x38d   : > { %v2383_v47 = vmax.f32 %v2367_v20, 0.0 }
 0x38f   : > { %2400 = vst.msk [vmem:[%s4024_s28 + $0x48] sm:$0xff] %vm2390_vm2, %v2383_v47 }
 0x390   : > { %v2336_v3 = vpop.f32.mrf.mxu2 }
 0x391   : > { %v2337_v53 = vadd.f32 %v2336_v3, %v2223_v41 }
 0x393   : > { %v2368_v40 = vadd.f32 %v4019_v16, %v2337_v53 }
 0x395   : > { %v2384_v49 = vmax.f32 %v2368_v40, 0.0 }
 0x397   : > { %2401 = vst.msk [vmem:[%s4024_s28 + $0x50] sm:$0xff] %vm2390_vm2, %v2384_v49 }
 0x398   : > { %v2339_v62 = vpop.f32.mrf.mxu2 }
 0x399   : > { %v2340_v18 = vadd.f32 %v2339_v62, %v2226_v56 }
 0x39b   : > { %v2369_v17 = vadd.f32 %v4019_v16, %v2340_v18 }
 0x39d   : > { %v2385_v7 = vmax.f32 %v2369_v17, 0.0 }
 0x39f   : > { %2402 = vst.msk [vmem:[%s4024_s28 + $0x58] sm:$0xff] %vm2390_vm2, %v2385_v7 }
 0x3a0   : > { %v2342_v59 = vpop.f32.mrf.mxu2 }
 0x3a1   : > { %v2343_v5 = vadd.f32 %v2342_v59, %v2229_v38 }
 0x3a3   : > { %v2370_v54 = vadd.f32 %v4019_v16, %v2343_v5 }
 0x3a5   : > { %v2386_v55 = vmax.f32 %v2370_v54, 0.0 }
 0x3a7   : > { %2403 = vst.msk [vmem:[%s4024_s28 + $0x60] sm:$0xff] %vm2390_vm2, %v2386_v55 }
 0x3a8   : > { %v2345_v36 = vpop.f32.mrf.mxu2 }
 0x3a9   : > { %v2346_v23 = vadd.f32 %v2345_v36, %v2232_v26 }
 0x3ab   : > { %v2371_v10 = vadd.f32 %v4019_v16, %v2346_v23 }
 0x3ad   : > { %v2387_v32 = vmax.f32 %v2371_v10, 0.0 }
 0x3af   : > { %2404 = vst.msk [vmem:[%s4024_s28 + $0x68] sm:$0xff] %vm2390_vm2, %v2387_v32 }
 0x3b0   : > { %v2348_v29 = vpop.f32.mrf.mxu2 }
 0x3b1   : > { %v2349_v52 = vadd.f32 %v2348_v29, %v2235_v21 }
 0x3b3   : > { %v2372_v61 = vadd.f32 %v4019_v16, %v2349_v52 }
 0x3b5   : > { %v2388_v57 = vmax.f32 %v2372_v61, 0.0 }
 0x3b7   : > { %2405 = vst.msk [vmem:[%s4024_s28 + $0x70] sm:$0xff] %vm2390_vm2, %v2388_v57 }
 0x3b8   : > { %v2351_v8 = vpop.f32.mrf.mxu2 }
 0x3b9   : > { %v2352_v27 = vadd.f32 %v2351_v8, %v2238_v34 }
 0x3bb   : > { %v2373_v4 = vadd.f32 %v4019_v16, %v2352_v27 }
 0x3bd   : > { %v2389_v43 = vmax.f32 %v2373_v4, 0.0 }
 0x3bf   : > { %2406 = vst.msk [vmem:[%s4024_s28 + $0x78] sm:$0xff] %vm2390_vm2, %v2389_v43 }
 0x3c0   : > { %2964 = shalt.err (!%p2961_p13)
}
 0x3c1   : > { %s3034_s15 = smov 128   ;;  %s3035_s28 = smov 8  }
 0x3c2   : > { %2860 = dma.vmem_to_hbm [thread:$0]  (%p3147_p3), %s2434_s20, 2048, %s2436_s21, %s2408_s3, %s3034_s15, %s3034_s15, %s3035_s28  }
 0x3c3 PF: > { %p2866_p0 = scmp.ge.s32.totalorder %s3031_s24, 2  ;;  %s2454_s25 = sand.u32 1, %s3003_s17  }
 0x3c4   : > { %s2455_s1 = scalar_lea.sflag [#allocation4], %s2454_s25 }
 0x3c5   : > { %p2863_p1 = pnand %p2866_p0, %p3156_p8 }
 0x3c7   : > { %p2864_p2 = pneg %p2863_p1 }
 0x3c9   : > { %2998 = dma.done.wait (%p2864_p2), %s2455_s1, 2048  }
 0x3ca   : > { %3000 = vsyncadd (%p2864_p2), %s2455_s1, 4294965248  ;;  %s25_s24 = sadd.s32 1, %s3031_s24   ;;  %s4179_s21 = sld [smem:[#allocation6_spill]] }
 0x3cb   : > { %p22_p4 = scmp.ge.s32.totalorder %s25_s24, 6   ;;  %s4180_s30 = sld [smem:[#allocation7_spill]] }
 0x3cc   : > { %s4181_s23 = sld [smem:[#allocation8_spill]]  ;;  %s4182_s17 = smov %s3007_s18 }
 0x3cd   : > { %s4183_s18 = smov %s3011_s19  ;;  %s4184_s19 = smov %s3165_s16 }
 0x3ce   : > { %s4185_s20 = smov %s3023_s22  ;;  %24 = sbr.rel (!%p22_p4) target bundleno = 8 (0x8), region = 116 }
 0x3d1   : > { %s4186_s22 = smov %s4180_s30 }
 0x3d3   :  { %2474 = vsyncpa [#allocation4], 1 }
 0x3d4   :  { %2476 = vsyncpa [#allocation4 + $0x1], 1 }

</bundles_post_ra>
